<compile_context>
chip_gen: v7x
topology: tpu7x:2x2x1
jax: 0.10.0
libtpu: 0.0.40
codegen_flags: <defaults>
</compile_context>

<pallas_src>
import jax
import jax.numpy as jnp
from jax.experimental import pallas as pl
from jax.experimental.pallas import tpu as pltpu

OUT_PAD = 128  # lane-dense padded width of the final logits (sliced to 3 outside)


def _softmax(x, axis):
    m = jnp.max(x, axis=axis, keepdims=True)
    ex = jnp.exp(x - m)
    s = jnp.sum(ex, axis=axis, keepdims=True)
    return ex * pl.reciprocal(s, approx=True)


def decomposable_attention_kernel(
    a_ref, b_ref,
    fw1_ref, fb1_ref, fw2_ref, fb2_ref,              # Attend.f
    gw1a_ref, gw1b_ref, gb1_ref, gw2_ref, gb2_ref,   # Compare.g (gw1 split along rows)
    hw1a_ref, hw1b_ref, hb1_ref, hw2_ref, hb2_ref,   # Aggregate.h (hw1 split along rows)
    lw_ref, lb_ref,                                  # Aggregate.linear (padded to OUT_PAD)
    out_ref,
):
    f32, bf16 = jnp.float32, jnp.bfloat16

    A = a_ref[...]           # [TB, La, E] bf16
    Bm = b_ref[...]          # [TB, Lb, E] bf16
    TB, La, E = A.shape
    Lb = Bm.shape[1]
    H = fw1_ref.shape[1]

    fw1, fb1, fw2, fb2 = fw1_ref[...], fb1_ref[...], fw2_ref[...], fb2_ref[...]
    gw1a, gw1b, gb1 = gw1a_ref[...], gw1b_ref[...], gb1_ref[...]
    gw2, gb2 = gw2_ref[...], gb2_ref[...]
    hw1a, hw1b, hb1 = hw1a_ref[...], hw1b_ref[...], hb1_ref[...]
    hw2, hb2 = hw2_ref[...], hb2_ref[...]
    lw, lb = lw_ref[...], lb_ref[...]

    # ---------------- Attend: f MLP, fused over A and B rows ----------------
    A2d = A.reshape(TB * La, E)
    B2d = Bm.reshape(TB * Lb, E)
    X = jnp.concatenate([A2d, B2d], axis=0)            # [TB*(La+Lb), E] bf16 (sublane concat)

    h = jnp.dot(X, fw1, preferred_element_type=f32) + fb1
    h = jnp.maximum(h, 0.0)
    fAB = jnp.dot(h.astype(bf16), fw2, preferred_element_type=f32) + fb2
    fAB = jnp.maximum(fAB, 0.0)                         # [TB*(La+Lb), H] f32
    f_A = fAB[: TB * La].reshape(TB, La, H).astype(bf16)
    f_B = fAB[TB * La:].reshape(TB, Lb, H).astype(bf16)

    # e[b,i,j] = <f_A[b,i], f_B[b,j]>  -- computed once; alpha uses softmax over i.
    e = jnp.einsum('bih,bjh->bij', f_A, f_B, preferred_element_type=f32)  # [TB, La, Lb] f32

    p_beta = _softmax(e, axis=-1).astype(bf16)          # normalized over j (Lb)
    p_alpha = _softmax(e, axis=-2).astype(bf16)         # normalized over i (La)

    beta = jnp.einsum('bij,bje->bie', p_beta, Bm, preferred_element_type=f32)   # [TB, La, E]
    alpha = jnp.einsum('bij,bie->bje', p_alpha, A, preferred_element_type=f32)  # [TB, Lb, E]

    # ---------------- Compare: g MLP, fused over A/B, concat -> weight split ----------------
    Y = jnp.concatenate(
        [beta.reshape(TB * La, E), alpha.reshape(TB * Lb, E)], axis=0).astype(bf16)
    g = (jnp.dot(X, gw1a, preferred_element_type=f32)
         + jnp.dot(Y, gw1b, preferred_element_type=f32) + gb1)
    g = jnp.maximum(g, 0.0)
    V = jnp.dot(g.astype(bf16), gw2, preferred_element_type=f32) + gb2
    V = jnp.maximum(V, 0.0)                             # [TB*(La+Lb), H] f32

    V_A = V[: TB * La].reshape(TB, La, H)
    V_B = V[TB * La:].reshape(TB, Lb, H)

    # ---------------- Aggregate (concat -> weight split on hw1) ----------------
    va_sum = jnp.sum(V_A, axis=1).astype(bf16)          # [TB, H]
    vb_sum = jnp.sum(V_B, axis=1).astype(bf16)          # [TB, H]
    hh = (jnp.dot(va_sum, hw1a, preferred_element_type=f32)
          + jnp.dot(vb_sum, hw1b, preferred_element_type=f32) + hb1)
    hh = jnp.maximum(hh, 0.0)
    hfeat = jnp.dot(hh.astype(bf16), hw2, preferred_element_type=f32) + hb2
    hfeat = jnp.maximum(hfeat, 0.0)                     # [TB, H] f32

    out_ref[...] = (jnp.dot(hfeat.astype(bf16), lw, preferred_element_type=f32)
                    + lb).astype(out_ref.dtype)         # [TB, OUT_PAD]


def decomposable_attention(A, B, params, *, batch_tile=8, num_outputs=3):
    """A, B: [batch, seq, embed] embeddings. Returns logits [batch, num_outputs]."""
    Bsz, La, E = A.shape
    Lb = B.shape[1]
    assert Bsz % batch_tile == 0, "batch must be divisible by batch_tile"

    A = A.astype(jnp.bfloat16)
    B = B.astype(jnp.bfloat16)

    data_specs = [
        pl.BlockSpec((batch_tile, La, E), lambda b: (b, 0, 0)),
        pl.BlockSpec((batch_tile, Lb, E), lambda b: (b, 0, 0)),
    ]

    def _resident(p):  # full array, same block every step -> stays in VMEM
        nd = p.ndim
        return pl.BlockSpec(p.shape, lambda b, _nd=nd: (0,) * _nd)

    weight_specs = [_resident(p) for p in params]

    out = pl.pallas_call(
        decomposable_attention_kernel,
        out_shape=jax.ShapeDtypeStruct((Bsz, OUT_PAD), jnp.float32),
        grid_spec=pltpu.PrefetchScalarGridSpec(
            num_scalar_prefetch=0,
            grid=(Bsz // batch_tile,),
            in_specs=data_specs + weight_specs,
            out_specs=pl.BlockSpec((batch_tile, OUT_PAD), lambda b: (b, 0)),
        ),
        compiler_params=pltpu.CompilerParams(
            dimension_semantics=("parallel",),          # megacore-shardable batch axis
            vmem_limit_bytes=48 * 1024 * 1024,          # explicit budget (fits v7x's 64 MiB)
        ),
    )(A, B, *params)
    return out[:, :num_outputs]


# ------------------------- parameter construction -------------------------

def _linear_params(key, n_in, n_out):
    kw, kb = jax.random.split(key)
    bound = 1.0 / jnp.sqrt(jnp.float32(n_in))
    w = jax.random.uniform(kw, (n_in, n_out), jnp.float32, -bound, bound)
    b = jax.random.uniform(kb, (1, n_out), jnp.float32, -bound, bound)
    return w, b


def init_params(key, embed_size, num_hiddens, num_outputs=3):
    """PyTorch-equivalent weights, pre-transposed to [in, out]."""
    n_attend = embed_size           # num_inputs_attend
    n_compare = 2 * embed_size      # num_inputs_compare
    n_agg = 2 * num_hiddens         # num_inputs_agg
    keys = jax.random.split(key, 7)
    fw1, fb1 = _linear_params(keys[0], n_attend, num_hiddens)
    fw2, fb2 = _linear_params(keys[1], num_hiddens, num_hiddens)
    gw1, gb1 = _linear_params(keys[2], n_compare, num_hiddens)
    gw2, gb2 = _linear_params(keys[3], num_hiddens, num_hiddens)
    hw1, hb1 = _linear_params(keys[4], n_agg, num_hiddens)
    hw2, hb2 = _linear_params(keys[5], num_hiddens, num_hiddens)
    lw, lb = _linear_params(keys[6], num_hiddens, num_outputs)
    return (fw1, fb1, fw2, fb2, gw1, gb1, gw2, gb2,
            hw1, hb1, hw2, hb2, lw, lb)


def prepare_params(raw, embed_size, num_hiddens, num_outputs=3):
    """Split concat-weights, pad final linear to OUT_PAD lanes, cast weights to bf16."""
    (fw1, fb1, fw2, fb2, gw1, gb1, gw2, gb2,
     hw1, hb1, hw2, hb2, lw, lb) = raw
    E, H = embed_size, num_hiddens
    gw1a, gw1b = gw1[:E], gw1[E:]          # concat([A, beta]) @ gw1 == A@gw1a + beta@gw1b
    hw1a, hw1b = hw1[:H], hw1[H:]          # concat([va, vb]) @ hw1 == va@hw1a + vb@hw1b
    lw_pad = jnp.zeros((H, OUT_PAD), jnp.float32).at[:, :num_outputs].set(lw)
    lb_pad = jnp.zeros((1, OUT_PAD), jnp.float32).at[:, :num_outputs].set(lb)
    bf = lambda w: w.astype(jnp.bfloat16)  # weights bf16 (MXU operands); biases stay f32
    return (bf(fw1), fb1, bf(fw2), fb2,
            bf(gw1a), bf(gw1b), gb1, bf(gw2), gb2,
            bf(hw1a), bf(hw1b), hb1, bf(hw2), hb2,
            bf(lw_pad), lb_pad)


if __name__ == "__main__":
    key = jax.random.PRNGKey(0)
    k_emb, k_prem, k_hyp, k_params = jax.random.split(key, 4)

    # Small, consistent shapes:
    #   vocab=50, embed_size=32, num_hiddens=64, batch=16, seq=8, batch_tile=8 -> grid=(2,)
    vocab_size, embed_size, num_hiddens = 50, 32, 64
    batch, seq, batch_tile = 16, 8, 8

    emb_table = 0.1 * jax.random.normal(k_emb, (vocab_size, embed_size), jnp.float32)
    premises = jax.random.randint(k_prem, (batch, seq), 0, vocab_size)
    hypotheses = jax.random.randint(k_hyp, (batch, seq), 0, vocab_size)

    # TODO(synk): embedding gather (data-dependent) stays outside the kernel as plain JAX.
    A = emb_table[premises]     # [batch, seq, embed]
    B = emb_table[hypotheses]   # [batch, seq, embed]

    raw = init_params(k_params, embed_size, num_hiddens)
    params = prepare_params(raw, embed_size, num_hiddens)

    y_hat = decomposable_attention(A, B, params, batch_tile=batch_tile)
    jax.block_until_ready(y_hat)
    assert y_hat.shape == (batch, 3) and y_hat.dtype == jnp.float32
    print("KERNEL_OK")
</pallas_src>

<mosaic_0001>
module attributes {stable_mosaic.version = 11 : i64} {
  func.func @decomposable_attention_kernel(%arg0: i32, %arg1: memref<8x8x32xbf16, #tpu.memory_space<vmem>>, %arg2: memref<8x8x32xbf16, #tpu.memory_space<vmem>>, %arg3: memref<32x64xbf16, #tpu.memory_space<vmem>>, %arg4: memref<1x64xf32, #tpu.memory_space<vmem>>, %arg5: memref<64x64xbf16, #tpu.memory_space<vmem>>, %arg6: memref<1x64xf32, #tpu.memory_space<vmem>>, %arg7: memref<32x64xbf16, #tpu.memory_space<vmem>>, %arg8: memref<32x64xbf16, #tpu.memory_space<vmem>>, %arg9: memref<1x64xf32, #tpu.memory_space<vmem>>, %arg10: memref<64x64xbf16, #tpu.memory_space<vmem>>, %arg11: memref<1x64xf32, #tpu.memory_space<vmem>>, %arg12: memref<64x64xbf16, #tpu.memory_space<vmem>>, %arg13: memref<64x64xbf16, #tpu.memory_space<vmem>>, %arg14: memref<1x64xf32, #tpu.memory_space<vmem>>, %arg15: memref<64x64xbf16, #tpu.memory_space<vmem>>, %arg16: memref<1x64xf32, #tpu.memory_space<vmem>>, %arg17: memref<64x128xbf16, #tpu.memory_space<vmem>>, %arg18: memref<1x128xf32, #tpu.memory_space<vmem>>, %arg19: memref<8x128xf32, #tpu.memory_space<vmem>>) attributes {dimension_semantics = [#tpu.dimension_semantics<parallel>], iteration_bounds = array<i64: 2>, scalar_prefetch = 0 : i64, scratch_operands = 0 : i64, tpu.core_type = #tpu.core_type<tc>, window_params = [{transform_indices = @transform_0, window_bounds = array<i64: 8, 8, 32>}, {transform_indices = @transform_1, window_bounds = array<i64: 8, 8, 32>}, {pipeline_mode = #tpu.pipeline_mode<synchronous>, transform_indices = @transform_2, window_bounds = array<i64: 32, 64>}, {pipeline_mode = #tpu.pipeline_mode<synchronous>, transform_indices = @transform_3, window_bounds = array<i64: 1, 64>}, {pipeline_mode = #tpu.pipeline_mode<synchronous>, transform_indices = @transform_4, window_bounds = array<i64: 64, 64>}, {pipeline_mode = #tpu.pipeline_mode<synchronous>, transform_indices = @transform_5, window_bounds = array<i64: 1, 64>}, {pipeline_mode = #tpu.pipeline_mode<synchronous>, transform_indices = @transform_6, window_bounds = array<i64: 32, 64>}, {pipeline_mode = #tpu.pipeline_mode<synchronous>, transform_indices = @transform_7, window_bounds = array<i64: 32, 64>}, {pipeline_mode = #tpu.pipeline_mode<synchronous>, transform_indices = @transform_8, window_bounds = array<i64: 1, 64>}, {pipeline_mode = #tpu.pipeline_mode<synchronous>, transform_indices = @transform_9, window_bounds = array<i64: 64, 64>}, {pipeline_mode = #tpu.pipeline_mode<synchronous>, transform_indices = @transform_10, window_bounds = array<i64: 1, 64>}, {pipeline_mode = #tpu.pipeline_mode<synchronous>, transform_indices = @transform_11, window_bounds = array<i64: 64, 64>}, {pipeline_mode = #tpu.pipeline_mode<synchronous>, transform_indices = @transform_12, window_bounds = array<i64: 64, 64>}, {pipeline_mode = #tpu.pipeline_mode<synchronous>, transform_indices = @transform_13, window_bounds = array<i64: 1, 64>}, {pipeline_mode = #tpu.pipeline_mode<synchronous>, transform_indices = @transform_14, window_bounds = array<i64: 64, 64>}, {pipeline_mode = #tpu.pipeline_mode<synchronous>, transform_indices = @transform_15, window_bounds = array<i64: 1, 64>}, {pipeline_mode = #tpu.pipeline_mode<synchronous>, transform_indices = @transform_16, window_bounds = array<i64: 64, 128>}, {pipeline_mode = #tpu.pipeline_mode<synchronous>, transform_indices = @transform_17, window_bounds = array<i64: 1, 128>}, {transform_indices = @transform_18, window_bounds = array<i64: 8, 128>}]} {
    %c0 = arith.constant 0 : index
    %c0_0 = arith.constant 0 : index
    %c0_1 = arith.constant 0 : index
    %0 = vector.load %arg1[%c0, %c0_0, %c0_1] : memref<8x8x32xbf16, #tpu.memory_space<vmem>>, vector<8x8x32xbf16>
    %c0_2 = arith.constant 0 : index
    %c0_3 = arith.constant 0 : index
    %c0_4 = arith.constant 0 : index
    %1 = vector.load %arg2[%c0_2, %c0_3, %c0_4] : memref<8x8x32xbf16, #tpu.memory_space<vmem>>, vector<8x8x32xbf16>
    %c0_5 = arith.constant 0 : index
    %c0_6 = arith.constant 0 : index
    %2 = vector.load %arg3[%c0_5, %c0_6] : memref<32x64xbf16, #tpu.memory_space<vmem>>, vector<32x64xbf16>
    %c0_7 = arith.constant 0 : index
    %c0_8 = arith.constant 0 : index
    %3 = vector.load %arg4[%c0_7, %c0_8] : memref<1x64xf32, #tpu.memory_space<vmem>>, vector<1x64xf32>
    %c0_9 = arith.constant 0 : index
    %c0_10 = arith.constant 0 : index
    %4 = vector.load %arg5[%c0_9, %c0_10] : memref<64x64xbf16, #tpu.memory_space<vmem>>, vector<64x64xbf16>
    %c0_11 = arith.constant 0 : index
    %c0_12 = arith.constant 0 : index
    %5 = vector.load %arg6[%c0_11, %c0_12] : memref<1x64xf32, #tpu.memory_space<vmem>>, vector<1x64xf32>
    %c0_13 = arith.constant 0 : index
    %c0_14 = arith.constant 0 : index
    %6 = vector.load %arg7[%c0_13, %c0_14] : memref<32x64xbf16, #tpu.memory_space<vmem>>, vector<32x64xbf16>
    %c0_15 = arith.constant 0 : index
    %c0_16 = arith.constant 0 : index
    %7 = vector.load %arg8[%c0_15, %c0_16] : memref<32x64xbf16, #tpu.memory_space<vmem>>, vector<32x64xbf16>
    %c0_17 = arith.constant 0 : index
    %c0_18 = arith.constant 0 : index
    %8 = vector.load %arg9[%c0_17, %c0_18] : memref<1x64xf32, #tpu.memory_space<vmem>>, vector<1x64xf32>
    %c0_19 = arith.constant 0 : index
    %c0_20 = arith.constant 0 : index
    %9 = vector.load %arg10[%c0_19, %c0_20] : memref<64x64xbf16, #tpu.memory_space<vmem>>, vector<64x64xbf16>
    %c0_21 = arith.constant 0 : index
    %c0_22 = arith.constant 0 : index
    %10 = vector.load %arg11[%c0_21, %c0_22] : memref<1x64xf32, #tpu.memory_space<vmem>>, vector<1x64xf32>
    %c0_23 = arith.constant 0 : index
    %c0_24 = arith.constant 0 : index
    %11 = vector.load %arg12[%c0_23, %c0_24] : memref<64x64xbf16, #tpu.memory_space<vmem>>, vector<64x64xbf16>
    %c0_25 = arith.constant 0 : index
    %c0_26 = arith.constant 0 : index
    %12 = vector.load %arg13[%c0_25, %c0_26] : memref<64x64xbf16, #tpu.memory_space<vmem>>, vector<64x64xbf16>
    %c0_27 = arith.constant 0 : index
    %c0_28 = arith.constant 0 : index
    %13 = vector.load %arg14[%c0_27, %c0_28] : memref<1x64xf32, #tpu.memory_space<vmem>>, vector<1x64xf32>
    %c0_29 = arith.constant 0 : index
    %c0_30 = arith.constant 0 : index
    %14 = vector.load %arg15[%c0_29, %c0_30] : memref<64x64xbf16, #tpu.memory_space<vmem>>, vector<64x64xbf16>
    %c0_31 = arith.constant 0 : index
    %c0_32 = arith.constant 0 : index
    %15 = vector.load %arg16[%c0_31, %c0_32] : memref<1x64xf32, #tpu.memory_space<vmem>>, vector<1x64xf32>
    %c0_33 = arith.constant 0 : index
    %c0_34 = arith.constant 0 : index
    %16 = vector.load %arg17[%c0_33, %c0_34] : memref<64x128xbf16, #tpu.memory_space<vmem>>, vector<64x128xbf16>
    %c0_35 = arith.constant 0 : index
    %c0_36 = arith.constant 0 : index
    %17 = vector.load %arg18[%c0_35, %c0_36] : memref<1x128xf32, #tpu.memory_space<vmem>>, vector<1x128xf32>
    %18 = vector.shape_cast %0 : vector<8x8x32xbf16> to vector<64x32xbf16>
    %19 = vector.shape_cast %1 : vector<8x8x32xbf16> to vector<64x32xbf16>
    %20 = tpu.concatenate %18, %19 in 0 : vector<64x32xbf16>, vector<64x32xbf16> -> vector<128x32xbf16>
    %cst = arith.constant dense<0.000000e+00> : vector<128x64xf32>
    %21 = tpu.matmul %20, %2, %cst {dimension_numbers = #tpu.dot_dimension_numbers<[1], [0], [0], [1], [0, 0, 1, 1], [], []>} : vector<128x32xbf16>, vector<32x64xbf16>, vector<128x64xf32> -> vector<128x64xf32>
    %22 = vector.broadcast %3 : vector<1x64xf32> to vector<128x64xf32>
    %23 = arith.addf %21, %22 : vector<128x64xf32>
    %cst_37 = arith.constant 0.000000e+00 : f32
    %24 = vector.broadcast %cst_37 : f32 to vector<128x64xf32>
    %25 = arith.maximumf %23, %24 : vector<128x64xf32>
    %26 = arith.truncf %25 : vector<128x64xf32> to vector<128x64xbf16>
    %cst_38 = arith.constant dense<0.000000e+00> : vector<128x64xf32>
    %27 = tpu.matmul %26, %4, %cst_38 {dimension_numbers = #tpu.dot_dimension_numbers<[1], [0], [0], [1], [0, 0, 1, 1], [], []>} : vector<128x64xbf16>, vector<64x64xbf16>, vector<128x64xf32> -> vector<128x64xf32>
    %28 = vector.broadcast %5 : vector<1x64xf32> to vector<128x64xf32>
    %29 = arith.addf %27, %28 : vector<128x64xf32>
    %cst_39 = arith.constant 0.000000e+00 : f32
    %30 = vector.broadcast %cst_39 : f32 to vector<128x64xf32>
    %31 = arith.maximumf %29, %30 : vector<128x64xf32>
    %32 = vector.extract_strided_slice %31 {offsets = [0, 0], sizes = [64, 64], strides = [1, 1]} : vector<128x64xf32> to vector<64x64xf32>
    %33 = vector.shape_cast %32 : vector<64x64xf32> to vector<8x8x64xf32>
    %34 = arith.truncf %33 : vector<8x8x64xf32> to vector<8x8x64xbf16>
    %35 = vector.extract_strided_slice %31 {offsets = [64, 0], sizes = [64, 64], strides = [1, 1]} : vector<128x64xf32> to vector<64x64xf32>
    %36 = vector.shape_cast %35 : vector<64x64xf32> to vector<8x8x64xf32>
    %37 = arith.truncf %36 : vector<8x8x64xf32> to vector<8x8x64xbf16>
    "tpu.trace_start"() <{level = 10 : i32, message = "bih,bjh->bij"}> : () -> ()
    %cst_40 = arith.constant dense<0.000000e+00> : vector<8x8x8xf32>
    %38 = tpu.matmul %34, %37, %cst_40 {dimension_numbers = #tpu.dot_dimension_numbers<[2], [2], [1], [1], [0, 0, 0, 1, 1, 1], [0], [0]>} : vector<8x8x64xbf16>, vector<8x8x64xbf16>, vector<8x8x8xf32> -> vector<8x8x8xf32>
    "tpu.trace_stop"() : () -> ()
    %cst_41 = arith.constant dense<0xFF800000> : vector<8x8xf32>
    %39 = vector.multi_reduction <maximumf>, %38, %cst_41 [2] : vector<8x8x8xf32> to vector<8x8xf32>
    %40 = vector.shape_cast %39 : vector<8x8xf32> to vector<8x8x1xf32>
    %41 = vector.broadcast %40 : vector<8x8x1xf32> to vector<8x8x8xf32>
    %42 = arith.subf %38, %41 : vector<8x8x8xf32>
    %43 = math.exp %42 : vector<8x8x8xf32>
    %cst_42 = arith.constant dense<0.000000e+00> : vector<8x8xf32>
    %44 = vector.multi_reduction <add>, %43, %cst_42 [2] : vector<8x8x8xf32> to vector<8x8xf32>
    %45 = vector.shape_cast %44 : vector<8x8xf32> to vector<8x8x1xf32>
    %46 = tpu.reciprocal %45 {approx = true} : vector<8x8x1xf32> -> vector<8x8x1xf32>
    %47 = vector.broadcast %46 : vector<8x8x1xf32> to vector<8x8x8xf32>
    %48 = arith.mulf %43, %47 : vector<8x8x8xf32>
    %49 = arith.truncf %48 : vector<8x8x8xf32> to vector<8x8x8xbf16>
    %cst_43 = arith.constant dense<0xFF800000> : vector<8x8xf32>
    %50 = vector.multi_reduction <maximumf>, %38, %cst_43 [1] : vector<8x8x8xf32> to vector<8x8xf32>
    %51 = vector.shape_cast %50 : vector<8x8xf32> to vector<8x1x8xf32>
    %52 = vector.broadcast %51 : vector<8x1x8xf32> to vector<8x8x8xf32>
    %53 = arith.subf %38, %52 : vector<8x8x8xf32>
    %54 = math.exp %53 : vector<8x8x8xf32>
    %cst_44 = arith.constant dense<0.000000e+00> : vector<8x8xf32>
    %55 = vector.multi_reduction <add>, %54, %cst_44 [1] : vector<8x8x8xf32> to vector<8x8xf32>
    %56 = vector.shape_cast %55 : vector<8x8xf32> to vector<8x1x8xf32>
    %57 = tpu.reciprocal %56 {approx = true} : vector<8x1x8xf32> -> vector<8x1x8xf32>
    %58 = vector.broadcast %57 : vector<8x1x8xf32> to vector<8x8x8xf32>
    %59 = arith.mulf %54, %58 : vector<8x8x8xf32>
    %60 = arith.truncf %59 : vector<8x8x8xf32> to vector<8x8x8xbf16>
    "tpu.trace_start"() <{level = 10 : i32, message = "bij,bje->bie"}> : () -> ()
    %cst_45 = arith.constant dense<0.000000e+00> : vector<8x8x32xf32>
    %61 = tpu.matmul %49, %1, %cst_45 {dimension_numbers = #tpu.dot_dimension_numbers<[2], [1], [1], [2], [0, 0, 0, 1, 1, 2], [0], [0]>} : vector<8x8x8xbf16>, vector<8x8x32xbf16>, vector<8x8x32xf32> -> vector<8x8x32xf32>
    "tpu.trace_stop"() : () -> ()
    "tpu.trace_start"() <{level = 10 : i32, message = "bij,bie->bje"}> : () -> ()
    %cst_46 = arith.constant dense<0.000000e+00> : vector<8x8x32xf32>
    %62 = tpu.matmul %60, %0, %cst_46 {dimension_numbers = #tpu.dot_dimension_numbers<[1], [1], [2], [2], [0, 0, 0, 2, 1, 2], [0], [0]>} : vector<8x8x8xbf16>, vector<8x8x32xbf16>, vector<8x8x32xf32> -> vector<8x8x32xf32>
    "tpu.trace_stop"() : () -> ()
    %63 = vector.shape_cast %61 : vector<8x8x32xf32> to vector<64x32xf32>
    %64 = vector.shape_cast %62 : vector<8x8x32xf32> to vector<64x32xf32>
    %65 = tpu.concatenate %63, %64 in 0 : vector<64x32xf32>, vector<64x32xf32> -> vector<128x32xf32>
    %66 = arith.truncf %65 : vector<128x32xf32> to vector<128x32xbf16>
    %cst_47 = arith.constant dense<0.000000e+00> : vector<128x64xf32>
    %67 = tpu.matmul %20, %6, %cst_47 {dimension_numbers = #tpu.dot_dimension_numbers<[1], [0], [0], [1], [0, 0, 1, 1], [], []>} : vector<128x32xbf16>, vector<32x64xbf16>, vector<128x64xf32> -> vector<128x64xf32>
    %cst_48 = arith.constant dense<0.000000e+00> : vector<128x64xf32>
    %68 = tpu.matmul %66, %7, %cst_48 {dimension_numbers = #tpu.dot_dimension_numbers<[1], [0], [0], [1], [0, 0, 1, 1], [], []>} : vector<128x32xbf16>, vector<32x64xbf16>, vector<128x64xf32> -> vector<128x64xf32>
    %69 = arith.addf %67, %68 : vector<128x64xf32>
    %70 = vector.broadcast %8 : vector<1x64xf32> to vector<128x64xf32>
    %71 = arith.addf %69, %70 : vector<128x64xf32>
    %cst_49 = arith.constant 0.000000e+00 : f32
    %72 = vector.broadcast %cst_49 : f32 to vector<128x64xf32>
    %73 = arith.maximumf %71, %72 : vector<128x64xf32>
    %74 = arith.truncf %73 : vector<128x64xf32> to vector<128x64xbf16>
    %cst_50 = arith.constant dense<0.000000e+00> : vector<128x64xf32>
    %75 = tpu.matmul %74, %9, %cst_50 {dimension_numbers = #tpu.dot_dimension_numbers<[1], [0], [0], [1], [0, 0, 1, 1], [], []>} : vector<128x64xbf16>, vector<64x64xbf16>, vector<128x64xf32> -> vector<128x64xf32>
    %76 = vector.broadcast %10 : vector<1x64xf32> to vector<128x64xf32>
    %77 = arith.addf %75, %76 : vector<128x64xf32>
    %cst_51 = arith.constant 0.000000e+00 : f32
    %78 = vector.broadcast %cst_51 : f32 to vector<128x64xf32>
    %79 = arith.maximumf %77, %78 : vector<128x64xf32>
    %80 = vector.extract_strided_slice %79 {offsets = [0, 0], sizes = [64, 64], strides = [1, 1]} : vector<128x64xf32> to vector<64x64xf32>
    %81 = vector.shape_cast %80 : vector<64x64xf32> to vector<8x8x64xf32>
    %82 = vector.extract_strided_slice %79 {offsets = [64, 0], sizes = [64, 64], strides = [1, 1]} : vector<128x64xf32> to vector<64x64xf32>
    %83 = vector.shape_cast %82 : vector<64x64xf32> to vector<8x8x64xf32>
    %cst_52 = arith.constant dense<0.000000e+00> : vector<8x64xf32>
    %84 = vector.multi_reduction <add>, %81, %cst_52 [1] : vector<8x8x64xf32> to vector<8x64xf32>
    %85 = arith.truncf %84 : vector<8x64xf32> to vector<8x64xbf16>
    %cst_53 = arith.constant dense<0.000000e+00> : vector<8x64xf32>
    %86 = vector.multi_reduction <add>, %83, %cst_53 [1] : vector<8x8x64xf32> to vector<8x64xf32>
    %87 = arith.truncf %86 : vector<8x64xf32> to vector<8x64xbf16>
    %cst_54 = arith.constant dense<0.000000e+00> : vector<8x64xf32>
    %88 = tpu.matmul %85, %11, %cst_54 {dimension_numbers = #tpu.dot_dimension_numbers<[1], [0], [0], [1], [0, 0, 1, 1], [], []>} : vector<8x64xbf16>, vector<64x64xbf16>, vector<8x64xf32> -> vector<8x64xf32>
    %cst_55 = arith.constant dense<0.000000e+00> : vector<8x64xf32>
    %89 = tpu.matmul %87, %12, %cst_55 {dimension_numbers = #tpu.dot_dimension_numbers<[1], [0], [0], [1], [0, 0, 1, 1], [], []>} : vector<8x64xbf16>, vector<64x64xbf16>, vector<8x64xf32> -> vector<8x64xf32>
    %90 = arith.addf %88, %89 : vector<8x64xf32>
    %91 = vector.broadcast %13 : vector<1x64xf32> to vector<8x64xf32>
    %92 = arith.addf %90, %91 : vector<8x64xf32>
    %cst_56 = arith.constant 0.000000e+00 : f32
    %93 = vector.broadcast %cst_56 : f32 to vector<8x64xf32>
    %94 = arith.maximumf %92, %93 : vector<8x64xf32>
    %95 = arith.truncf %94 : vector<8x64xf32> to vector<8x64xbf16>
    %cst_57 = arith.constant dense<0.000000e+00> : vector<8x64xf32>
    %96 = tpu.matmul %95, %14, %cst_57 {dimension_numbers = #tpu.dot_dimension_numbers<[1], [0], [0], [1], [0, 0, 1, 1], [], []>} : vector<8x64xbf16>, vector<64x64xbf16>, vector<8x64xf32> -> vector<8x64xf32>
    %97 = vector.broadcast %15 : vector<1x64xf32> to vector<8x64xf32>
    %98 = arith.addf %96, %97 : vector<8x64xf32>
    %cst_58 = arith.constant 0.000000e+00 : f32
    %99 = vector.broadcast %cst_58 : f32 to vector<8x64xf32>
    %100 = arith.maximumf %98, %99 : vector<8x64xf32>
    %101 = arith.truncf %100 : vector<8x64xf32> to vector<8x64xbf16>
    %cst_59 = arith.constant dense<0.000000e+00> : vector<8x128xf32>
    %102 = tpu.matmul %101, %16, %cst_59 {dimension_numbers = #tpu.dot_dimension_numbers<[1], [0], [0], [1], [0, 0, 1, 1], [], []>} : vector<8x64xbf16>, vector<64x128xbf16>, vector<8x128xf32> -> vector<8x128xf32>
    %103 = vector.broadcast %17 : vector<1x128xf32> to vector<8x128xf32>
    %104 = arith.addf %102, %103 : vector<8x128xf32>
    %c0_60 = arith.constant 0 : index
    %c0_61 = arith.constant 0 : index
    %105 = vector.load %arg19[%c0_60, %c0_61] : memref<8x128xf32, #tpu.memory_space<vmem>>, vector<8x128xf32>
    tpu.vector_store %arg19[%c0_60, %c0_61], %104 {strides = array<i32>} : memref<8x128xf32, #tpu.memory_space<vmem>>, vector<8x128xf32>,
    return
  }
  func.func @transform_0(%arg0: i32) -> (i32, i32, i32) {
    %c0_i32 = arith.constant 0 : i32
    %c0_i32_0 = arith.constant 0 : i32
    %c0_i32_1 = arith.constant 0 : i32
    return %arg0, %c0_i32, %c0_i32_0 : i32, i32, i32
  }
  func.func @transform_1(%arg0: i32) -> (i32, i32, i32) {
    %c0_i32 = arith.constant 0 : i32
    %c0_i32_0 = arith.constant 0 : i32
    %c0_i32_1 = arith.constant 0 : i32
    return %arg0, %c0_i32, %c0_i32_0 : i32, i32, i32
  }
  func.func @transform_2(%arg0: i32) -> (i32, i32) {
    %c0_i32 = arith.constant 0 : i32
    %c0_i32_0 = arith.constant 0 : i32
    %c0_i32_1 = arith.constant 0 : i32
    return %c0_i32, %c0_i32_0 : i32, i32
  }
  func.func @transform_3(%arg0: i32) -> (i32, i32) {
    %c0_i32 = arith.constant 0 : i32
    %c0_i32_0 = arith.constant 0 : i32
    %c0_i32_1 = arith.constant 0 : i32
    return %c0_i32, %c0_i32_0 : i32, i32
  }
  func.func @transform_4(%arg0: i32) -> (i32, i32) {
    %c0_i32 = arith.constant 0 : i32
    %c0_i32_0 = arith.constant 0 : i32
    %c0_i32_1 = arith.constant 0 : i32
    return %c0_i32, %c0_i32_0 : i32, i32
  }
  func.func @transform_5(%arg0: i32) -> (i32, i32) {
    %c0_i32 = arith.constant 0 : i32
    %c0_i32_0 = arith.constant 0 : i32
    %c0_i32_1 = arith.constant 0 : i32
    return %c0_i32, %c0_i32_0 : i32, i32
  }
  func.func @transform_6(%arg0: i32) -> (i32, i32) {
    %c0_i32 = arith.constant 0 : i32
    %c0_i32_0 = arith.constant 0 : i32
    %c0_i32_1 = arith.constant 0 : i32
    return %c0_i32, %c0_i32_0 : i32, i32
  }
  func.func @transform_7(%arg0: i32) -> (i32, i32) {
    %c0_i32 = arith.constant 0 : i32
    %c0_i32_0 = arith.constant 0 : i32
    %c0_i32_1 = arith.constant 0 : i32
    return %c0_i32, %c0_i32_0 : i32, i32
  }
  func.func @transform_8(%arg0: i32) -> (i32, i32) {
    %c0_i32 = arith.constant 0 : i32
    %c0_i32_0 = arith.constant 0 : i32
    %c0_i32_1 = arith.constant 0 : i32
    return %c0_i32, %c0_i32_0 : i32, i32
  }
  func.func @transform_9(%arg0: i32) -> (i32, i32) {
    %c0_i32 = arith.constant 0 : i32
    %c0_i32_0 = arith.constant 0 : i32
    %c0_i32_1 = arith.constant 0 : i32
    return %c0_i32, %c0_i32_0 : i32, i32
  }
  func.func @transform_10(%arg0: i32) -> (i32, i32) {
    %c0_i32 = arith.constant 0 : i32
    %c0_i32_0 = arith.constant 0 : i32
    %c0_i32_1 = arith.constant 0 : i32
    return %c0_i32, %c0_i32_0 : i32, i32
  }
  func.func @transform_11(%arg0: i32) -> (i32, i32) {
    %c0_i32 = arith.constant 0 : i32
    %c0_i32_0 = arith.constant 0 : i32
    %c0_i32_1 = arith.constant 0 : i32
    return %c0_i32, %c0_i32_0 : i32, i32
  }
  func.func @transform_12(%arg0: i32) -> (i32, i32) {
    %c0_i32 = arith.constant 0 : i32
    %c0_i32_0 = arith.constant 0 : i32
    %c0_i32_1 = arith.constant 0 : i32
    return %c0_i32, %c0_i32_0 : i32, i32
  }
  func.func @transform_13(%arg0: i32) -> (i32, i32) {
    %c0_i32 = arith.constant 0 : i32
    %c0_i32_0 = arith.constant 0 : i32
    %c0_i32_1 = arith.constant 0 : i32
    return %c0_i32, %c0_i32_0 : i32, i32
  }
  func.func @transform_14(%arg0: i32) -> (i32, i32) {
    %c0_i32 = arith.constant 0 : i32
    %c0_i32_0 = arith.constant 0 : i32
    %c0_i32_1 = arith.constant 0 : i32
    return %c0_i32, %c0_i32_0 : i32, i32
  }
  func.func @transform_15(%arg0: i32) -> (i32, i32) {
    %c0_i32 = arith.constant 0 : i32
    %c0_i32_0 = arith.constant 0 : i32
    %c0_i32_1 = arith.constant 0 : i32
    return %c0_i32, %c0_i32_0 : i32, i32
  }
  func.func @transform_16(%arg0: i32) -> (i32, i32) {
    %c0_i32 = arith.constant 0 : i32
    %c0_i32_0 = arith.constant 0 : i32
    %c0_i32_1 = arith.constant 0 : i32
    return %c0_i32, %c0_i32_0 : i32, i32
  }
  func.func @transform_17(%arg0: i32) -> (i32, i32) {
    %c0_i32 = arith.constant 0 : i32
    %c0_i32_0 = arith.constant 0 : i32
    %c0_i32_1 = arith.constant 0 : i32
    return %c0_i32, %c0_i32_0 : i32, i32
  }
  func.func @transform_18(%arg0: i32) -> (i32, i32) {
    %c0_i32 = arith.constant 0 : i32
    %c0_i32_0 = arith.constant 0 : i32
    return %arg0, %c0_i32 : i32, i32
  }
}

</mosaic_0001>

<bundles_post_ra>
// kernel: tpu_custom_call.1
= control target key start
LH: loop header
LB: loop body
LE: loop exit
PB: predicated region body
PF: predicated region fallthrough
CT: control target
= control target key end

     0   :  { %s6205_s0 = inlined_call_operand.hbm [shape: bf16[16,8,32], index: 0, kind: input, shape index: {}]   ;;  %s6206_s1 = inlined_call_operand.hbm [shape: bf16[16,8,32], index: 1, kind: input, shape index: {}]   ;;  %s6207_s2 = inlined_call_operand.hbm [shape: bf16[32,64], index: 2, kind: input, shape index: {}]   ;;  %s6208_s3 = inlined_call_operand.vmem [shape: f32[1,64], index: 3, kind: input, shape index: {}]   ;;  %s6209_s4 = inlined_call_operand.hbm [shape: bf16[64,64], index: 4, kind: input, shape index: {}]   ;;  %s6210_s5 = inlined_call_operand.vmem [shape: f32[1,64], index: 5, kind: input, shape index: {}]   ;;  %s6211_s6 = inlined_call_operand.hbm [shape: bf16[32,64], index: 6, kind: input, shape index: {}]   ;;  %s6212_s7 = inlined_call_operand.hbm [shape: bf16[32,64], index: 7, kind: input, shape index: {}]   ;;  %s6213_s8 = inlined_call_operand.hbm [shape: f32[1,64], index: 8, kind: input, shape index: {}]   ;;  %s6214_s9 = inlined_call_operand.vmem [shape: bf16[64,64], index: 9, kind: input, shape index: {}]   ;;  %s6215_s10 = inlined_call_operand.vmem [shape: f32[1,64], index: 10, kind: input, shape index: {}]   ;;  %s6216_s11 = inlined_call_operand.hbm [shape: bf16[64,64], index: 11, kind: input, shape index: {}]   ;;  %s6217_s12 = inlined_call_operand.hbm [shape: bf16[64,64], index: 12, kind: input, shape index: {}]   ;;  %s6218_s13 = inlined_call_operand.vmem [shape: f32[1,64], index: 13, kind: input, shape index: {}]   ;;  %s6219_s14 = inlined_call_operand.hbm [shape: bf16[64,64], index: 14, kind: input, shape index: {}]   ;;  %s6220_s15 = inlined_call_operand.vmem [shape: f32[1,64], index: 15, kind: input, shape index: {}]   ;;  %s6221_s16 = inlined_call_operand.hbm [shape: bf16[64,128], index: 16, kind: input, shape index: {}]   ;;  %s6222_s17 = inlined_call_operand.vmem [shape: f32[1,128], index: 17, kind: input, shape index: {}]   ;;  %s6223_s18 = inlined_call_operand.hbm [shape: f32[16,128], index: 18, kind: output, shape index: {}]  }
   0x1   :  { %6238 = sst [smem:[#allocation29_spill]] %s6205_s0 }
   0x2   :  { %6239 = sst [smem:[#allocation30_spill]] %s6206_s1 }
   0x3   :  { %6240 = sst [smem:[#allocation31_spill]] %s6207_s2 }
   0x4   :  { %6241 = sst [smem:[#allocation32_spill]] %s6208_s3 }
   0x5   :  { %6242 = sst [smem:[#allocation33_spill]] %s6209_s4 }
   0x6   :  { %6243 = sst [smem:[#allocation34_spill]] %s6210_s5 }
   0x7   :  { %6244 = sst [smem:[#allocation35_spill]] %s6211_s6 }
   0x8   :  { %6245 = sst [smem:[#allocation36_spill]] %s6212_s7 }
   0x9   :  { %6246 = sst [smem:[#allocation37_spill]] %s6213_s8 }
   0xa   :  { %6247 = sst [smem:[#allocation38_spill]] %s6214_s9 }
   0xb   :  { %6248 = sst [smem:[#allocation39_spill]] %s6215_s10 }
   0xc   :  { %6249 = sst [smem:[#allocation40_spill]] %s6216_s11 }
   0xd   :  { %6250 = sst [smem:[#allocation41_spill]] %s6217_s12 }
   0xe   :  { %6251 = sst [smem:[#allocation42_spill]] %s6218_s13 }
   0xf   :  { %6252 = sst [smem:[#allocation43_spill]] %s6219_s14 }
  0x10   :  { %6253 = sst [smem:[#allocation44_spill]] %s6220_s15 }
  0x11   :  { %6254 = sst [smem:[#allocation45_spill]] %s6222_s17 }
  0x12   :  { %6255 = sst [smem:[#allocation46_spill]] %s6223_s18 }
  0x13   :  { %23 = vsyncpa [#allocation3], 0 }
  0x14   :  { %25 = vsyncpa [#allocation3 + $0x1], 0 }
  0x15   :  { %26 = vsyncpa [#allocation6], 0 }
  0x16   :  { %28 = vsyncpa [#allocation6 + $0x1], 0 }
  0x17   :  { %29 = vsyncpa [#allocation9], 0 }
  0x18   :  { %30 = vsyncpa [#allocation12], 0 }
  0x19   :  { %31 = vsyncpa [#allocation15], 0 }
  0x1a   :  { %32 = vsyncpa [#allocation18], 0 }
  0x1b   :  { %33 = vsyncpa [#allocation4], 0 }
  0x1c   :  { %35 = vsyncpa [#allocation4 + $0x1], 0  ;;  %s5214_s27 = smov 0   ;;  %s5216_s28 = smov 0  }
  0x1d   :  { %s5218_s29 = smov 0   ;;  %s5220_s30 = smov 0  }
  0x1e LB: > { %s5103_s0 = smov [#allocation7]   ;;  %s5235_s1 = sadd.s32 4294967295, %s5101_s30   ;;  %s5101_s30 = sphi %s5220_s30, %s6301_s30   ;;  %s5097_s29 = sphi %s5218_s29, %s6300_s29   ;;  %s5093_s28 = sphi %s5216_s28, %s6299_s28   ;;  %s5089_s27 = sphi %s5214_s27, %s6298_s27  }
  0x1f   : > { %s472_s19 = sshll.u32 %s5103_s0, 4  ;;  %p3849_p0 = scmp.ge.s32.totalorder %s5101_s30, 1  ;;  %s5240_s19 = int_to_ptr.vmem [resolvable:$true] %s472_s19 }
  0x20   : > { %p6230_p1 = scmp.eq.s32.totalorder %s5235_s1, 0  ;;  %p460_p2 = scmp.lt.s32.totalorder %s5101_s30, 3 }
  0x21   : > { %s5104_s21 = smov [#allocation8]   ;;  %s5105_s23 = smov [#allocation11]  }
  0x22   : > { %p5242_p3 = pnand %p3849_p0, %p460_p2  ;;  %s488_s22 = sshll.u32 %s5104_s21, 4  ;;  %s5255_s22 = int_to_ptr.vmem [resolvable:$true] %s488_s22 }
  0x23   : > { %s517_s24 = sshll.u32 %s5105_s23, 4  ;;  %s6258_s0 = sld [smem:[#allocation31_spill]]  ;;  %s5257_s24 = int_to_ptr.vmem [resolvable:$true] %s517_s24 }
  0x24   : > { %s6256_s20 = scalar_select %p5242_p3, 1, 0 }
  0x25   : > { %p4478_p5 = pneg %p5242_p3 }
  0x27   : > { %p5251_p6 = pnand %p4478_p5, %p6230_p1 }
  0x29   : > { %s4699_s18 = scalar_lea.hbm %s6258_s0, 256  ;;  %p5267_p8 = pneg %p5251_p6 }
  0x2a   : > { %p4700_p7 = scmp.ne.s32.totalorder %s6258_s0, %s4699_s18  ;;  %p4706_p11 = scmp.lt.u32.totalorder %s4699_s18, %s6258_s0 }
  0x2c   : > { %p4702_p9 = pnand %p5267_p8, %p4700_p7 }
  0x2e   : > { %p4703_p10 = pneg %p4702_p9 }
  0x30   : > { %p4708_p12 = pnand %p4706_p11, %p4703_p10 }
  0x32   : > { %4711 = shalt.err (!%p4708_p12)
}
  0x33   : > { %s4712_s15 = scalar_lea.vmem %s5240_s19, 256  ;;  %p4720_p5 = scmp.lt.s32.totalorder %s5240_s19, %s5240_s19 }
  0x34   : > { %p4713_p13 = scmp.ne.s32.totalorder %s5240_s19, %s4712_s15  ;;  %p4721_p4 = scmp.lt.s32.totalorder %s4712_s15, %s4712_s15 }
  0x36   : > { %p4715_p0 = pnand %p4713_p13, %p5267_p8  ;;  %p4722_p7 = por %p4721_p4, %p4720_p5 }
  0x38   : > { %p4716_p2 = pneg %p4715_p0 }
  0x3a   : > { %p4723_p9 = pnand %p4722_p7, %p4716_p2 }
  0x3c   : > { %4726 = shalt.err (!%p4723_p9)
}
  0x3d   : > { %s6232_s17 = smov 64   ;;  %s6234_s13 = smov 4  }
  0x3e   : > { %4481 = dma.hbm_to_vmem [thread:$0]  (!%p5251_p6), %s6258_s0, 256, %s5240_s19, [#allocation6], %s6232_s17, %s6232_s17, %s6234_s13  }
  0x3f   : > { %s6260_s4 = sld [smem:[#allocation33_spill]] }
  0x45   : > { %s4727_s15 = scalar_lea.hbm %s6260_s4, 512 }
  0x46   : > { %p4728_p4 = scmp.ne.s32.totalorder %s6260_s4, %s4727_s15  ;;  %p4734_p12 = scmp.lt.u32.totalorder %s4727_s15, %s6260_s4 }
  0x48   : > { %p4730_p10 = pnand %p4728_p4, %p5267_p8 }
  0x4a   : > { %p4731_p11 = pneg %p4730_p10 }
  0x4c   : > { %p4736_p13 = pnand %p4734_p12, %p4731_p11 }
  0x4e   : > { %4739 = shalt.err (!%p4736_p13)
}
  0x4f   : > { %s4740_s19 = scalar_lea.vmem %s5255_s22, 512  ;;  %p4748_p7 = scmp.lt.s32.totalorder %s5255_s22, %s5255_s22 }
  0x50   : > { %p4741_p0 = scmp.ne.s32.totalorder %s5255_s22, %s4740_s19  ;;  %p4749_p9 = scmp.lt.s32.totalorder %s4740_s19, %s4740_s19 }
  0x52   : > { %p4743_p2 = pnand %p4741_p0, %p5267_p8  ;;  %p4750_p4 = por %p4749_p9, %p4748_p7 }
  0x54   : > { %p4744_p5 = pneg %p4743_p2 }
  0x56   : > { %p4751_p10 = pnand %p4750_p4, %p4744_p5 }
  0x58   : > { %4754 = shalt.err (!%p4751_p10)
}
  0x59   : > { %4484 = dma.hbm_to_vmem [thread:$0]  (!%p5251_p6), %s6260_s4, 512, %s5255_s22, [#allocation9], %s6232_s17, %s6232_s17, %s6234_s13  }
  0x5a   : > { %s6261_s7 = sld [smem:[#allocation36_spill]] }
  0x60   : > { %s4755_s18 = scalar_lea.hbm %s6261_s7, 256 }
  0x61   : > { %p4756_p11 = scmp.ne.s32.totalorder %s6261_s7, %s4755_s18  ;;  %p4762_p0 = scmp.lt.u32.totalorder %s4755_s18, %s6261_s7 }
  0x63   : > { %p4758_p12 = pnand %p4756_p11, %p5267_p8 }
  0x65   : > { %p4759_p13 = pneg %p4758_p12 }
  0x67   : > { %p4764_p2 = pnand %p4762_p0, %p4759_p13 }
  0x69   : > { %4767 = shalt.err (!%p4764_p2)
}
  0x6a   : > { %s4768_s22 = scalar_lea.vmem %s5257_s24, 256  ;;  %p4776_p4 = scmp.lt.s32.totalorder %s5257_s24, %s5257_s24 }
  0x6b   : > { %p4769_p5 = scmp.ne.s32.totalorder %s5257_s24, %s4768_s22  ;;  %p4777_p10 = scmp.lt.s32.totalorder %s4768_s22, %s4768_s22 }
  0x6d   : > { %p4771_p7 = pnand %p4769_p5, %p5267_p8  ;;  %p4778_p11 = por %p4777_p10, %p4776_p4 }
  0x6f   : > { %p4772_p9 = pneg %p4771_p7 }
  0x71   : > { %p4779_p12 = pnand %p4778_p11, %p4772_p9 }
  0x73   : > { %4782 = shalt.err (!%p4779_p12)
}
  0x74   : > { %4490 = dma.hbm_to_vmem [thread:$0]  (!%p5251_p6), %s6261_s7, 256, %s5257_s24, [#allocation12], %s6232_s17, %s6232_s17, %s6234_s13  }
  0x75   : > { %s5108_s5 = smov [#allocation14]   ;;  %s5109_s10 = smov [#allocation17]  }
  0x76   : > { %s547_s9 = sshll.u32 %s5108_s5, 4  ;;  %s576_s18 = sshll.u32 %s5109_s10, 4  ;;  %s548_s9 = int_to_ptr.vmem [resolvable:$true] %s547_s9  ;;  %s577_s18 = int_to_ptr.vmem [resolvable:$true] %s576_s18 }
  0x77   : > { %s6262_s11 = sld [smem:[#allocation40_spill]] }
  0x7d   : > { %s4783_s23 = scalar_lea.hbm %s6262_s11, 512 }
  0x7e   : > { %p4784_p13 = scmp.ne.s32.totalorder %s6262_s11, %s4783_s23  ;;  %p4790_p5 = scmp.lt.u32.totalorder %s4783_s23, %s6262_s11 }
  0x80   : > { %p4786_p0 = pnand %p4784_p13, %p5267_p8 }
  0x82   : > { %p4787_p2 = pneg %p4786_p0 }
  0x84   : > { %p4792_p7 = pnand %p4790_p5, %p4787_p2 }
  0x86   : > { %4795 = shalt.err (!%p4792_p7)
}
  0x87   : > { %s4796_s24 = scalar_lea.vmem %s548_s9, 512  ;;  %p4804_p11 = scmp.lt.s32.totalorder %s548_s9, %s548_s9 }
  0x88   : > { %p4797_p9 = scmp.ne.s32.totalorder %s548_s9, %s4796_s24  ;;  %p4805_p12 = scmp.lt.s32.totalorder %s4796_s24, %s4796_s24 }
  0x8a   : > { %p4799_p4 = pnand %p4797_p9, %p5267_p8  ;;  %p4806_p1 = por %p4805_p12, %p4804_p11 }
  0x8c   : > { %p4800_p10 = pneg %p4799_p4 }
  0x8e   : > { %p4807_p3 = pnand %p4806_p1, %p4800_p10 }
  0x90   : > { %4810 = shalt.err (!%p4807_p3)
}
  0x91   : > { %4496 = dma.hbm_to_vmem [thread:$0]  (!%p5251_p6), %s6262_s11, 512, %s548_s9, [#allocation15], %s6232_s17, %s6232_s17, %s6234_s13  }
  0x92   : > { %s6263_s14 = sld [smem:[#allocation43_spill]] }
  0x98   : > { %s4811_s25 = scalar_lea.hbm %s6263_s14, 512 }
  0x99   : > { %p4812_p1 = scmp.ne.s32.totalorder %s6263_s14, %s4811_s25  ;;  %p4818_p0 = scmp.lt.u32.totalorder %s4811_s25, %s6263_s14 }
  0x9b   : > { %p4814_p3 = pnand %p4812_p1, %p5267_p8 }
  0x9d   : > { %p4815_p13 = pneg %p4814_p3 }
  0x9f   : > { %p4820_p2 = pnand %p4818_p0, %p4815_p13 }
  0xa1   : > { %4823 = shalt.err (!%p4820_p2)
}
  0xa2   : > { %s4824_s19 = scalar_lea.vmem %s577_s18, 512  ;;  %p4832_p4 = scmp.lt.s32.totalorder %s577_s18, %s577_s18 }
  0xa3   : > { %p4825_p5 = scmp.ne.s32.totalorder %s577_s18, %s4824_s19  ;;  %p4833_p10 = scmp.lt.s32.totalorder %s4824_s19, %s4824_s19 }
  0xa5   : > { %p4827_p7 = pnand %p4825_p5, %p5267_p8  ;;  %p4834_p11 = por %p4833_p10, %p4832_p4 }
  0xa7   : > { %p4828_p9 = pneg %p4827_p7 }
  0xa9   : > { %p4835_p12 = pnand %p4834_p11, %p4828_p9 }
  0xab   : > { %4838 = shalt.err (!%p4835_p12)
}
  0xac   : > { %4502 = dma.hbm_to_vmem [thread:$0]  (!%p5251_p6), %s6263_s14, 512, %s577_s18, [#allocation18], %s6232_s17, %s6232_s17, %s6234_s13  }
  0xad   : > { %s5110_s0 = smov [#allocation10]   ;;  %s5111_s5 = smov [#allocation13]  }
  0xae   : > { %s504_s3 = sshll.u32 %s5110_s0, 4  ;;  %s531_s10 = sshll.u32 %s5111_s5, 4  ;;  %s505_s3 = int_to_ptr.vmem [resolvable:$true] %s504_s3  ;;  %s532_s10 = int_to_ptr.vmem [resolvable:$true] %s531_s10 }
  0xaf   : > { %s6264_s6 = sld [smem:[#allocation35_spill]] }
  0xb5   : > { %s4839_s23 = scalar_lea.hbm %s6264_s6, 256 }
  0xb6   : > { %p4840_p1 = scmp.ne.s32.totalorder %s6264_s6, %s4839_s23  ;;  %p4846_p0 = scmp.lt.u32.totalorder %s4839_s23, %s6264_s6 }
  0xb8   : > { %p4842_p3 = pnand %p4840_p1, %p5267_p8 }
  0xba   : > { %p4843_p13 = pneg %p4842_p3 }
  0xbc   : > { %p4848_p2 = pnand %p4846_p0, %p4843_p13 }
  0xbe   : > { %4851 = shalt.err (!%p4848_p2)
}
  0xbf   : > { %s4852_s18 = scalar_lea.vmem %s505_s3, 256  ;;  %p4860_p4 = scmp.lt.s32.totalorder %s505_s3, %s505_s3 }
  0xc0   : > { %p4853_p5 = scmp.ne.s32.totalorder %s505_s3, %s4852_s18  ;;  %p4861_p10 = scmp.lt.s32.totalorder %s4852_s18, %s4852_s18 }
  0xc2   : > { %p4855_p7 = pnand %p4853_p5, %p5267_p8  ;;  %p4862_p11 = por %p4861_p10, %p4860_p4 }
  0xc4   : > { %p4856_p9 = pneg %p4855_p7 }
  0xc6   : > { %p4863_p12 = pnand %p4862_p11, %p4856_p9 }
  0xc8   : > { %4866 = shalt.err (!%p4863_p12)
}
  0xc9   : > { %4487 = dma.hbm_to_vmem [thread:$0]  (!%p5251_p6), %s6264_s6, 256, %s505_s3, [#allocation9], %s6232_s17, %s6232_s17, %s6234_s13  }
  0xca   : > { %s6265_s8 = sld [smem:[#allocation37_spill]] }
  0xd0   : > { %s4867_s26 = scalar_lea.hbm %s6265_s8, 16 }
  0xd1   : > { %p4868_p1 = scmp.ne.s32.totalorder %s6265_s8, %s4867_s26  ;;  %p4874_p0 = scmp.lt.u32.totalorder %s4867_s26, %s6265_s8 }
  0xd3   : > { %p4870_p3 = pnand %p4868_p1, %p5267_p8 }
  0xd5   : > { %p4871_p13 = pneg %p4870_p3 }
  0xd7   : > { %p4876_p2 = pnand %p4874_p0, %p4871_p13 }
  0xd9   : > { %4879 = shalt.err (!%p4876_p2)
}
  0xda   : > { %s4880_s9 = scalar_lea.vmem %s532_s10, 16  ;;  %s4887_s3 = scalar_lea.vmem %s532_s10, 32 }
  0xdb   : > { %p4881_p5 = scmp.ne.s32.totalorder %s532_s10, %s4880_s9  ;;  %p4888_p4 = scmp.lt.s32.totalorder %s532_s10, %s532_s10 }
  0xdc   : > { %p4889_p10 = scmp.lt.s32.totalorder %s4887_s3, %s4880_s9 }
  0xdd   : > { %p4883_p7 = pnand %p4881_p5, %p5267_p8 }
  0xde   : > { %p4890_p11 = por %p4889_p10, %p4888_p4 }
  0xdf   : > { %p4884_p9 = pneg %p4883_p7 }
  0xe1   : > { %p4891_p12 = pnand %p4890_p11, %p4884_p9 }
  0xe3   : > { %4894 = shalt.err (!%p4891_p12)
}
  0xe4   : > { %4493 = dma.hbm_to_vmem [thread:$0]  (!%p5251_p6), %s6265_s8, 16, %s532_s10, [#allocation12]  }
  0xe5   : > { %s5112_s0 = smov [#allocation16]   ;;  %s5113_s25 = smov [#allocation19]  }
  0xe6   : > { %s560_s5 = sshll.u32 %s5112_s0, 4  ;;  %s592_s26 = sshll.u32 %s5113_s25, 4  ;;  %s561_s5 = int_to_ptr.vmem [resolvable:$true] %s560_s5  ;;  %s593_s26 = int_to_ptr.vmem [resolvable:$true] %s592_s26 }
  0xe7   : > { %s6266_s12 = sld [smem:[#allocation41_spill]] }
  0xed   : > { %s4895_s22 = scalar_lea.hbm %s6266_s12, 512 }
  0xee   : > { %p4896_p1 = scmp.ne.s32.totalorder %s6266_s12, %s4895_s22  ;;  %p4902_p0 = scmp.lt.u32.totalorder %s4895_s22, %s6266_s12 }
  0xf0   : > { %p4898_p3 = pnand %p4896_p1, %p5267_p8 }
  0xf2   : > { %p4899_p13 = pneg %p4898_p3 }
  0xf4   : > { %p4904_p2 = pnand %p4902_p0, %p4899_p13 }
  0xf6   : > { %4907 = shalt.err (!%p4904_p2)
}
  0xf7   : > { %s4908_s10 = scalar_lea.vmem %s561_s5, 512  ;;  %p4916_p4 = scmp.lt.s32.totalorder %s561_s5, %s561_s5 }
  0xf8   : > { %p4909_p5 = scmp.ne.s32.totalorder %s561_s5, %s4908_s10  ;;  %p4917_p10 = scmp.lt.s32.totalorder %s4908_s10, %s4908_s10 }
  0xfa   : > { %p4911_p7 = pnand %p4909_p5, %p5267_p8  ;;  %p4918_p11 = por %p4917_p10, %p4916_p4 }
  0xfc   : > { %p4912_p9 = pneg %p4911_p7 }
  0xfe   : > { %p4919_p12 = pnand %p4918_p11, %p4912_p9 }
 0x100   : > { %4922 = shalt.err (!%p4919_p12)
}
 0x101   : > { %4499 = dma.hbm_to_vmem [thread:$0]  (!%p5251_p6), %s6266_s12, 512, %s561_s5, [#allocation15], %s6232_s17, %s6232_s17, %s6234_s13  }
 0x102   : > { %s4923_s15 = scalar_lea.hbm %s6221_s16, 512 }
 0x103   : > { %p4924_p1 = scmp.ne.s32.totalorder %s6221_s16, %s4923_s15  ;;  %p4930_p0 = scmp.lt.u32.totalorder %s4923_s15, %s6221_s16 }
 0x105   : > { %p4926_p3 = pnand %p4924_p1, %p5267_p8 }
 0x107   : > { %p4927_p13 = pneg %p4926_p3 }
 0x109   : > { %p4932_p2 = pnand %p4930_p0, %p4927_p13 }
 0x10b   : > { %4935 = shalt.err (!%p4932_p2)
}
 0x10c   : > { %s4936_s18 = scalar_lea.vmem %s593_s26, 512  ;;  %p4944_p4 = scmp.lt.s32.totalorder %s593_s26, %s593_s26 }
 0x10d   : > { %p4937_p5 = scmp.ne.s32.totalorder %s593_s26, %s4936_s18  ;;  %p4945_p10 = scmp.lt.s32.totalorder %s4936_s18, %s4936_s18 }
 0x10f   : > { %p4939_p7 = pnand %p4937_p5, %p5267_p8  ;;  %p4946_p11 = por %p4945_p10, %p4944_p4 }
 0x111   : > { %p4940_p9 = pneg %p4939_p7 }
 0x113   : > { %p4947_p12 = pnand %p4946_p11, %p4940_p9 }
 0x115   : > { %4950 = shalt.err (!%p4947_p12)
}
 0x116   : > { %4505 = dma.hbm_to_vmem [thread:$0]  (!%p5251_p6), %s6221_s16, 512, %s593_s26, [#allocation18], %s6232_s17, %s6232_s17, %s6234_s13  }
 0x117   : > { %s3848_s2 = sadd.s32 4294967294, %s5101_s30   ;;  %s5468_s21 = sadd.s32 1, %s5101_s30  }
 0x118   : > { %s48_s24 = sadd.s32 1, %s5097_s29  ;;  %s45_s0 = ssub.s32 %s5101_s30, %s5468_s21 }
 0x119   : > { %p55_p8 = scmp.ne.s32.totalorder %s5097_s29, %s5093_s28  ;;  %p46_p1 = scmp.eq.s32.totalorder %s45_s0, 0 }
 0x11a   : > { %p56_p3 = scmp.eq.s32.totalorder %s5101_s30, 0  ;;  %p61_p13 = scmp.ne.s32.totalorder %s5093_s28, %s5089_s27 }
 0x11b   : > { %p447_p0 = scmp.eq.s32.totalorder %s5235_s1, 1  ;;  %p6267_p5 = scmp.eq.s32.totalorder %s5235_s1, 0 }
 0x11c   : > { %s5480_s25 = scalar_select %p46_p1, %s5097_s29, %s48_s24  }
 0x11d   : > { %p57_p2 = por %p56_p3, %p55_p8  ;;  %p5484_p7 = por %p6267_p5, %p61_p13 }
 0x11e   : > { %p5488_p6 = por %p447_p0, %p55_p8  ;;  %p453_p9 = scmp.eq.s32.totalorder %s3848_s2, 1 }
 0x11f   : > { %p4526_p4 = scmp.lt.s32.totalorder %s5101_s30, 2  ;;  %s609_s15 = sand.u32 1, %s5097_s29  }
 0x120   : > { %s6269_s26 = scalar_select %p5488_p6, 1, 0 }
 0x121   : > { %p5494_p10 = por %p453_p9, %p61_p13  ;;  %s5498_s19 = sshll.u32 %s609_s15, 5 }
 0x122   : > { %s3996_s9 = sshll.u32 %s5101_s30, 9  ;;  %s6271_s5 = sld [smem:[#allocation29_spill]] }
 0x123   : > { %s6270_s22 = scalar_select %p5494_p10, 1, 0 }
 0x124   : > { %s613_s2 = scalar_lea.vmem [#allocation2], %s5498_s19  ;;  %p5507_p11 = pnand %p4526_p4, %p57_p2 }
 0x125   : > { %s620_s24 = sshll.u32 %s613_s2, 4  ;;  %s6273_s4 = sld [smem:[#allocation30_spill]]  ;;  %s5511_s24 = int_to_ptr.vmem [resolvable:$true] %s620_s24 }
 0x126   : > { %s5518_s18 = scalar_lea.sflag [#allocation3], %s609_s15  ;;  %p4953_p8 = pneg %p5507_p11 }
 0x128   : > { %s5504_s10 = scalar_lea.hbm %s6271_s5, %s3996_s9  ;;  %s4956_s8 = scalar_lea.hbm %s6271_s5, 1024 }
 0x129   : > { %s4951_s6 = scalar_lea.hbm %s5504_s10, 512  ;;  %p4957_p13 = scmp.lt.u32.totalorder %s5504_s10, %s6271_s5 }
 0x12a   : > { %p4952_p12 = scmp.ne.s32.totalorder %s5504_s10, %s4951_s6  ;;  %p4958_p0 = scmp.lt.u32.totalorder %s4956_s8, %s4951_s6 }
 0x12b   : > { %s5516_s3 = scalar_lea.hbm %s6273_s4, %s3996_s9  ;;  %p4960_p5 = scmp.lt.u32.totalorder %s4951_s6, %s5504_s10 }
 0x12c   : > { %p4954_p1 = pnand %p4953_p8, %p4952_p12  ;;  %p4959_p2 = por %p4958_p0, %p4957_p13 }
 0x12e   : > { %p4955_p3 = pneg %p4954_p1  ;;  %p4961_p9 = por %p4960_p5, %p4959_p2 }
 0x130   : > { %p4962_p4 = pnand %p4961_p9, %p4955_p3 }
 0x132   : > { %4965 = shalt.err (!%p4962_p4)
}
 0x133   : > { %s4966_s17 = scalar_lea.vmem %s5511_s24, 512  ;;  %s5114_s7 = smov [#allocation2]  }
 0x134   : > { %p4967_p12 = scmp.ne.s32.totalorder %s5511_s24, %s4966_s17  ;;  %s4971_s13 = sshll.u32 %s5114_s7, 4  ;;  %s4972_s13 = int_to_ptr.vmem [resolvable:$false] %s4971_s13 }
 0x135   : > { %s4973_s11 = scalar_lea.vmem %s4972_s13, 1024  ;;  %p4974_p6 = scmp.lt.s32.totalorder %s5511_s24, %s4972_s13 }
 0x136   : > { %p4969_p1 = pnand %p4967_p12, %p4953_p8  ;;  %p4975_p13 = scmp.lt.s32.totalorder %s4973_s11, %s4966_s17 }
 0x138   : > { %p4970_p10 = pneg %p4969_p1  ;;  %p4976_p0 = por %p4975_p13, %p4974_p6 }
 0x13a   : > { %p4977_p2 = pnand %p4976_p0, %p4970_p10 }
 0x13c   : > { %4980 = shalt.err (!%p4977_p2)
}
 0x13d   : > { %s6274_s6 = smov 4   ;;  %s6275_s8 = smov 64  }
 0x13e   : > { %4509 = dma.hbm_to_vmem [thread:$0]  (!%p5507_p11), %s5504_s10, 512, %s5511_s24, %s5518_s18, %s6275_s8, %s6275_s8, %s6274_s6  }
 0x13f   : > { %s634_s12 = scalar_lea.vmem [#allocation5], %s5498_s19  ;;  %s630_s9 = sand.u32 1, %s5101_s30  }
 0x140   : > { %s641_s15 = sshll.u32 %s634_s12, 4  ;;  %s5553_s2 = scalar_lea.sflag [#allocation6], %s630_s9  ;;  %s5551_s15 = int_to_ptr.vmem [resolvable:$true] %s641_s15 }
 0x141   : > { %s4981_s17 = scalar_lea.hbm %s5516_s3, 512  ;;  %s4986_s11 = scalar_lea.hbm %s6273_s4, 1024 }
 0x142   : > { %p4982_p6 = scmp.ne.s32.totalorder %s5516_s3, %s4981_s17  ;;  %p4987_p5 = scmp.lt.u32.totalorder %s5516_s3, %s6273_s4 }
 0x143   : > { %p4988_p9 = scmp.lt.u32.totalorder %s4986_s11, %s4981_s17  ;;  %p4990_p12 = scmp.lt.u32.totalorder %s4981_s17, %s5516_s3 }
 0x144   : > { %p4984_p10 = pnand %p4982_p6, %p4953_p8 }
 0x145   : > { %p4989_p4 = por %p4988_p9, %p4987_p5 }
 0x146   : > { %p4985_p3 = pneg %p4984_p10 }
 0x147   : > { %p4991_p1 = por %p4990_p12, %p4989_p4 }
 0x149   : > { %p4992_p13 = pnand %p4991_p1, %p4985_p3 }
 0x14b   : > { %4995 = shalt.err (!%p4992_p13)
}
 0x14c   : > { %s4996_s19 = scalar_lea.vmem %s5551_s15, 512  ;;  %s5115_s10 = smov [#allocation5]  }
 0x14d   : > { %p4997_p0 = scmp.ne.s32.totalorder %s5551_s15, %s4996_s19  ;;  %s5001_s24 = sshll.u32 %s5115_s10, 4  ;;  %s5002_s24 = int_to_ptr.vmem [resolvable:$false] %s5001_s24 }
 0x14e   : > { %s5003_s14 = scalar_lea.vmem %s5002_s24, 1024  ;;  %p5004_p10 = scmp.lt.s32.totalorder %s5551_s15, %s5002_s24 }
 0x14f   : > { %p4999_p2 = pnand %p4997_p0, %p4953_p8  ;;  %p5005_p5 = scmp.lt.s32.totalorder %s5003_s14, %s4996_s19 }
 0x151   : > { %p5000_p6 = pneg %p4999_p2  ;;  %p5006_p9 = por %p5005_p5, %p5004_p10 }
 0x153   : > { %p5007_p4 = pnand %p5006_p9, %p5000_p6 }
 0x155   : > { %5010 = shalt.err (!%p5007_p4)
}
 0x156   : > { %4512 = dma.hbm_to_vmem [thread:$0]  (!%p5507_p11), %s5516_s3, 512, %s5551_s15, %s5553_s2, %s6275_s8, %s6275_s8, %s6274_s6  }
 0x157   : > { %p6276_p8 = scmp.ne.s32.totalorder %s6256_s20, 0 }
 0x158   : > { %s5585_s5 = sand.u32 (!%p6276_p8), 1, %s5093_s28  }
 0x159   : > { %653 = sbr.rel (%p6276_p8) target bundleno = 2836 (0xb14), region = 92  ;;  %s3867_s18 = sshll.u32 (!%p6276_p8), %s5585_s5, 5 }
 0x15a   : > { %s656_s12 = scalar_lea.sflag (!%p6276_p8), [#allocation3], %s5585_s5  ;;  %s5589_s9 = scalar_lea.vmem (!%p6276_p8), [#allocation2], %s3867_s18 }
 0x160   : > { %5056 = dma.done.wait (%p5484_p7), %s656_s12, 512  }
 0x161   : > { %5058 = vsyncadd (%p5484_p7), %s656_s12, 4294966784  ;;  %s664_s0 = sand.u32 1, %s5235_s1   ;;  %s5596_s3 = scalar_lea.vmem [#allocation5], %s3867_s18 }
 0x162   : > { %s665_s20 = scalar_lea.sflag [#allocation6], %s664_s0 }
 0x163   : > { %5060 = dma.done.wait (%p5484_p7), %s665_s20, 512  }
 0x164   : > { %5062 = vsyncadd (%p5484_p7), %s665_s20, 4294966784  ;;  %p6277_p11 = scmp.eq.s32.totalorder %s5235_s1, 0 }
 0x166   : > { %5064 = dma.done.wait (%p6277_p11), [#allocation6], 256   ;;  %p6278_p3 = pmov %p6277_p11 }
 0x168   : > { %5066 = vsyncadd (%p6278_p3), [#allocation6], 4294967040  ;;  %p6279_p12 = pmov %p6278_p3 }
 0x169   : > { %p6280_p1 = pmov %p6278_p3 }
 0x16a   : > { %5068 = dma.done.wait (%p6279_p12), [#allocation9], 768  }
 0x16b   : > { %5070 = vsyncadd (%p6280_p1), [#allocation9], 4294966528  ;;  %p6281_p13 = pmov %p6280_p1 }
 0x16c   : > { %p6282_p0 = pmov %p6280_p1 }
 0x16d   : > { %5072 = dma.done.wait (%p6281_p13), [#allocation12], 272  }
 0x16e   : > { %5074 = vsyncadd (%p6282_p0), [#allocation12], 4294967024  ;;  %p6283_p7 = pmov %p6282_p0 }
 0x16f   : > { %p6284_p2 = pmov %p6282_p0 }
 0x170   : > { %5076 = dma.done.wait (%p6283_p7), [#allocation15], 1024  }
 0x171   : > { %5078 = vsyncadd (%p6284_p2), [#allocation15], 4294966272  ;;  %p6285_p6 = pmov %p6282_p0 }
 0x172   : > { %p6286_p10 = pmov %p6282_p0 }
 0x173   : > { %5080 = dma.done.wait (%p6285_p6), [#allocation18], 1024  }
 0x174   : > { %5082 = vsyncadd (%p6286_p10), [#allocation18], 4294966272  ;;  %v4583_v0 = vld [vmem:[#allocation7] sm:$0xff]   ;;  %v4584_v1 = vld [vmem:[#allocation7 + $0x8] sm:$0xff]   ;;  %vm906_vm0 = vcmask 261120   ;;  %s6287_s8 = sld [smem:[#allocation32_spill]] }
 0x175   : > { %4120 = vmatprep.subr.bf16.mxu0 %v4583_v0  ;;  %v765_v2 = vld [vmem:[%s5589_s9] sm:$0xf]  ;;  %v766_v3 = vld [vmem:[%s5589_s9 + $0x4] sm:$0xf]  ;;  %v767_v5 = vld [vmem:[%s5589_s9 + $0x8] sm:$0xf] }
 0x176   : > { %4121 = vmatpush3.bf16.msra.mxu0 %v4583_v0  ;;  %v5624_v4 = vcombine.low %v765_v2, %v766_v3  ;;  %v768_v6 = vld [vmem:[%s5589_s9 + $0xc] sm:$0xf]  ;;  %v769_v7 = vld [vmem:[%s5589_s9 + $0x10] sm:$0xf]  ;;  %v770_v8 = vld [vmem:[%s5589_s9 + $0x14] sm:$0xf] }
 0x177   : > { %4122 = vmatprep.subr.bf16.mxu0 %v4584_v1  ;;  %v5632_v9 = vcombine.low %v767_v5, %v768_v6  ;;  %v5634_v10 = vcombine.low %v769_v7, %v770_v8  ;;  %v4593_v11 = vld [vmem:[#allocation8] sm:$0xff]   ;;  %v771_v12 = vld [vmem:[%s5589_s9 + $0x18] sm:$0xf]  ;;  %v772_v13 = vld [vmem:[%s5589_s9 + $0x1c] sm:$0xf]  ;;  %vm1082_vm1 = vcmask 523264  }
 0x178   : > { %4124 = vmatprep.mubr.msk.bf16.mxu0 %vm906_vm0, %v5624_v4  ;;  %v4594_v14 = vld [vmem:[#allocation8 + $0x8] sm:$0xff]   ;;  %v5641_v15 = vld [vmem:[%s5596_s3] sm:$0xf]  ;;  %v5644_v16 = vld [vmem:[%s5596_s3 + $0x4] sm:$0xf]  ;;  %4140 = vmatprep.subr.bf16.mxu1 %v4593_v11  ;;  %v5648_v17 = vcombine.low %v771_v12, %v772_v13  ;;  %vm5117_vm2 = vmmov 0  }
 0x179   : > { %4141 = vmatpush3.bf16.msra.mxu1 %v4593_v11  ;;  %v5652_v18 = vcombine.low %v5641_v15, %v5644_v16  ;;  %v775_v19 = vld [vmem:[%s5596_s3 + $0x8] sm:$0xf]  ;;  %v776_v20 = vld [vmem:[%s5596_s3 + $0xc] sm:$0xf]  ;;  %v777_v21 = vld [vmem:[%s5596_s3 + $0x10] sm:$0xf] }
 0x17a   : > { %4123 = vmatpush3.bf16.msra.mxu0 %v4584_v1  ;;  %4142 = vmatprep.subr.bf16.mxu1 %v4594_v14  ;;  %v778_v22 = vld [vmem:[%s5596_s3 + $0x14] sm:$0xf]  ;;  %v5662_v23 = vcombine.low %v775_v19, %v776_v20  ;;  %v779_v25 = vld [vmem:[%s5596_s3 + $0x18] sm:$0xf]  ;;  %v780_v26 = vld [vmem:[%s5596_s3 + $0x1c] sm:$0xf] }
 0x17b   : > { %v5664_v24 = vcombine.low %v777_v21, %v778_v22  ;;  %v5672_v27 = vcombine.low %v779_v25, %v780_v26  ;;  %v4595_v28 = vld [vmem:[#allocation8 + $0x10] sm:$0xff]   ;;  %v4596_v29 = vld [vmem:[#allocation8 + $0x18] sm:$0xff]   ;;  %s6288_s17 = sld [smem:[#allocation34_spill]]  ;;  %vm1604_vm3 = vcmask 64512   ;;  %vm1856_vm4 = vcmask 1043456   ;;  %s6289_s11 = sld [smem:[#allocation38_spill]] }
 0x17c   : > { %v3887_v30 = vld [vmem:[%s6287_s8] ss:$0 sm:$0xff]  ;;  %s6290_s20 = sld [smem:[#allocation39_spill]]  ;;  %vm3325_vm5 = vcmask 1041409   ;;  %vm3327_vm6 = vcmask 1042434   ;;  %vm3329_vm7 = vcmask 1043459  }
 0x17d   : > { %4125 = vmatmul.mubr.msk.bf16.vlgmr.msra.gmra.mrb[0].mxu0 %vm906_vm0, %v5632_v9  ;;  %4143 = vmatpush3.bf16.msra.mxu1 %v4594_v14  ;;  %vm3331_vm8 = vcmask 1044484   ;;  %vm3333_vm9 = vcmask 1045509   ;;  %vm3335_vm10 = vcmask 1046534   ;;  %vm3337_vm11 = vcmask 1047559   ;;  %s6291_s6 = sld [smem:[#allocation42_spill]]  ;;  %s6292_s2 = sld [smem:[#allocation44_spill]] }
 0x17e   : > { %4128 = vmatprep.mubr.msk.bf16.mxu0 %vm906_vm0, %v5634_v10  ;;  %4144 = vmatprep.subr.bf16.mxu1 %v4595_v28  ;;  %s6293_s19 = sld [smem:[#allocation45_spill]]  ;;  %s3993_s10 = sshll.u32 %s5235_s1, 7 }
 0x17f   : > { %p6295_p9 = scmp.ne.s32.totalorder %s6269_s26, 0 }
 0x181   : > { %4145 = vmatpush3.bf16.msra.mxu1 %v4595_v28 }
 0x182   : > { %4146 = vmatprep.subr.bf16.mxu1 %v4596_v29 }
 0x185   : > { %4129 = vmatmul.mubr.msk.bf16.gmra.mrb[4].mxu0 %vm906_vm0, %v5648_v17  ;;  %4147 = vmatpush3.bf16.msra.mxu1 %v4596_v29 }
 0x186   : > { %4132 = vmatprep.mubr.msk.bf16.mxu0 %vm906_vm0, %v5652_v18 }
 0x18d   : > { %4133 = vmatmul.mubr.msk.bf16.gmra.mrb[8].mxu0 %vm906_vm0, %v5662_v23 }
 0x18e   : > { %4136 = vmatprep.mubr.msk.bf16.mxu0 %vm906_vm0, %v5664_v24 }
 0x195   : > { %4137 = vmatmul.mubr.msk.bf16.gmra.mrb[12].mxu0 %vm906_vm0, %v5672_v27 }
 0x250   : > { %v4126_v31 = vpop.f32.mrb[0].mxu0 }
 0x251   : > { %v974_v32 = vadd.f32 %v4126_v31, %v3887_v30  ;;  %v965_v33 = vpop.f32.mrb[1].mxu0 }
 0x252   : > { %v966_v34 = vadd.f32 %v3887_v30, %v965_v33  ;;  %v4127_v35 = vpop.f32.mrb[2].mxu0 }
 0x253   : > { %v977_v36 = vadd.f32 %v4127_v35, %v3887_v30  ;;  %v968_v37 = vpop.f32.mrb[3].mxu0  ;;  %v1030_v39 = vmax.f32 %v974_v32, 0.0 }
 0x254   : > { %v969_v38 = vadd.f32 %v3887_v30, %v968_v37  ;;  %v1028_v41 = vmax.f32 %v966_v34, 0.0  ;;  %v5116_v34 = vmov 0.0  }
 0x255   : > { %v1031_v40 = vmax.f32 %v977_v36, 0.0  ;;  %4164 = vmatprep.subr.bf16.mxu1 %v5116_v34  ;;  %4170 = vmatprep.subr.bf16.mxu0 %v5116_v34 }
 0x256   : > { %v1029_v42 = vmax.f32 %v969_v38, 0.0  ;;  %4172 = vmatprep.mubr.msk.bf16.mxu0 %vm5117_vm2, %v5116_v34 }
 0x257   : > { %v1045_v43 = vpack.c.bf16 %v1031_v40, %v1030_v39 }
 0x258   : > { %v4130_v44 = vpop.f32.mrb[4].mxu0  ;;  %v1044_v45 = vpack.c.bf16 %v1029_v42, %v1028_v41 }
 0x259   : > { %v990_v46 = vadd.f32 %v4130_v44, %v3887_v30  ;;  %v981_v47 = vpop.f32.mrb[5].mxu0 }
 0x25a   : > { %v982_v48 = vadd.f32 %v3887_v30, %v981_v47  ;;  %v4131_v49 = vpop.f32.mrb[6].mxu0  ;;  %4148 = vmatprep.mubr.msk.bf16.mxu1 %vm1082_vm1, %v1044_v45 }
 0x25b   : > { %v993_v50 = vadd.f32 %v4131_v49, %v3887_v30  ;;  %v984_v51 = vpop.f32.mrb[7].mxu0  ;;  %4149 = vmatmul.mubr.msk.bf16.vlgmr.msra.gmra.mrb[0].mxu1 %vm1082_vm1, %v1045_v43  ;;  %v1034_v53 = vmax.f32 %v990_v46, 0.0  ;;  %v5700_v43 = vld [vmem:[%s6288_s17] ss:$0 sm:$0xff]  ;;  %s3878_s17 = sshll.u32 %s5585_s5, 3 }
 0x25c   : > { %v985_v52 = vadd.f32 %v3887_v30, %v984_v51  ;;  %v1032_v55 = vmax.f32 %v982_v48, 0.0  ;;  %s761_s24 = scalar_lea.vmem [#allocation20], %s3878_s17 }
 0x25d   : > { %v1035_v54 = vmax.f32 %v993_v50, 0.0  ;;  %s3670_s14 = sshll.u32 %s761_s24, 4  ;;  %s6163_s14 = int_to_ptr.vmem [resolvable:$true] %s3670_s14 }
 0x25e   : > { %v1033_v56 = vmax.f32 %v985_v52, 0.0  ;;  %s5011_s1 = scalar_lea.vmem %s6163_s14, 128 }
 0x25f   : > { %v1047_v57 = vpack.c.bf16 %v1035_v54, %v1034_v53  ;;  %p5012_p5 = scmp.ne.s32.totalorder %s6163_s14, %s5011_s1 }
 0x260   : > { %v1046_v58 = vpack.c.bf16 %v1033_v56, %v1032_v55  ;;  %v4134_v59 = vpop.f32.mrb[8].mxu0 }
 0x261   : > { %v1006_v60 = vadd.f32 %v4134_v59, %v3887_v30  ;;  %v997_v61 = vpop.f32.mrb[9].mxu0  ;;  %p5013_p4 = pnand %p5012_p5, %p6295_p9 }
 0x262   : > { %v998_v62 = vadd.f32 %v3887_v30, %v997_v61  ;;  %v4135_v63 = vpop.f32.mrb[10].mxu0  ;;  %4152 = vmatprep.mubr.msk.bf16.mxu1 %vm1082_vm1, %v1046_v58 }
 0x263   : > { %v1009_v0 = vadd.f32 %v4135_v63, %v3887_v30  ;;  %v1000_v1 = vpop.f32.mrb[11].mxu0  ;;  %4153 = vmatmul.mubr.msk.bf16.gmra.mrb[4].mxu1 %vm1082_vm1, %v1047_v57  ;;  %v1038_v3 = vmax.f32 %v1006_v60, 0.0  ;;  %p5014_p8 = pneg %p5013_p4 }
 0x264   : > { %v1001_v2 = vadd.f32 %v3887_v30, %v1000_v1  ;;  %v1036_v6 = vmax.f32 %v998_v62, 0.0 }
 0x265   : > { %v1039_v5 = vmax.f32 %v1009_v0, 0.0 }
 0x266   : > { %v1037_v7 = vmax.f32 %v1001_v2, 0.0 }
 0x267   : > { %v1049_v8 = vpack.c.bf16 %v1039_v5, %v1038_v3 }
 0x268   : > { %v1048_v11 = vpack.c.bf16 %v1037_v7, %v1036_v6  ;;  %v4138_v12 = vpop.f32.mrb[12].mxu0 }
 0x269   : > { %v1022_v13 = vadd.f32 %v4138_v12, %v3887_v30  ;;  %v1013_v14 = vpop.f32.mrb[13].mxu0 }
 0x26a   : > { %4156 = vmatprep.mubr.msk.bf16.mxu1 %vm1082_vm1, %v1048_v11  ;;  %v1014_v19 = vadd.f32 %v3887_v30, %v1013_v14  ;;  %v4139_v20 = vpop.f32.mrb[14].mxu0 }
 0x26b   : > { %4157 = vmatmul.mubr.msk.bf16.gmra.mrb[8].mxu1 %vm1082_vm1, %v1049_v8  ;;  %v1042_v21 = vmax.f32 %v1022_v13, 0.0  ;;  %v1025_v22 = vadd.f32 %v4139_v20, %v3887_v30  ;;  %v1016_v25 = vpop.f32.mrb[15].mxu0 }
 0x26c   : > { %v1040_v26 = vmax.f32 %v1014_v19, 0.0  ;;  %v1017_v28 = vadd.f32 %v3887_v30, %v1016_v25 }
 0x26d   : > { %v1043_v29 = vmax.f32 %v1025_v22, 0.0 }
 0x26e   : > { %v1041_v31 = vmax.f32 %v1017_v28, 0.0 }
 0x26f   : > { %v1051_v32 = vpack.c.bf16 %v1043_v29, %v1042_v21 }
 0x270   : > { %v1050_v33 = vpack.c.bf16 %v1041_v31, %v1040_v26 }
 0x272   : > { %4160 = vmatprep.mubr.msk.bf16.mxu1 %vm1082_vm1, %v1050_v33 }
 0x273   : > { %4161 = vmatmul.mubr.msk.bf16.gmra.mrb[12].mxu1 %vm1082_vm1, %v1051_v32 }
 0x274   : > { %4166 = vmatprep.mubr.msk.bf16.mxu1 %vm5117_vm2, %v5116_v34 }
 0x32e   : > { %v4150_v30 = vpop.f32.mrb[0].mxu1 }
 0x32f   : > { %v1141_v35 = vpop.f32.mrb[1].mxu1  ;;  %v1150_v6 = vadd.f32 %v4150_v30, %v5700_v43 }
 0x330   : > { %v4151_v36 = vpop.f32.mrb[2].mxu1  ;;  %v1142_v51 = vadd.f32 %v5700_v43, %v1141_v35 }
 0x331   : > { %v1144_v37 = vpop.f32.mrb[3].mxu1  ;;  %v1153_v12 = vadd.f32 %v4151_v36, %v5700_v43  ;;  %v1206_v20 = vmax.f32 %v1150_v6, 0.0 }
 0x332   : > { %v1145_v55 = vadd.f32 %v5700_v43, %v1144_v37  ;;  %v1204_v61 = vmax.f32 %v1142_v51, 0.0 }
 0x333   : > { %v1207_v25 = vmax.f32 %v1153_v12, 0.0  ;;  %v1222_v29 = vpack.c.bf16 %v1206_v20, %v1206_v20 }
 0x334   : > { %v1205_v2 = vmax.f32 %v1145_v55, 0.0  ;;  %v1220_v7 = vpack.c.bf16 %v1204_v61, %v1204_v61 }
 0x335   : > { %v1223_v30 = vpack.c.bf16 %v1207_v25, %v1207_v25 }
 0x336   : > { %v5693_v38 = vpop.f32.mrb[4].mxu1  ;;  %v1221_v13 = vpack.c.bf16 %v1205_v2, %v1205_v2 }
 0x337   : > { %v1157_v39 = vpop.f32.mrb[5].mxu1 }
 0x338   : > { %v5695_v40 = vpop.f32.mrb[6].mxu1  ;;  %v1158_v31 = vadd.f32 %v5700_v43, %v1157_v39 }
 0x339   : > { %v1160_v41 = vpop.f32.mrb[7].mxu1 }
 0x33a   : > { %v1161_v35 = vadd.f32 %v5700_v43, %v1160_v41 }
 0x33c   : > { %v1209_v41 = vmax.f32 %v1161_v35, 0.0 }
 0x33e   : > { %v4158_v42 = vpop.f32.mrb[8].mxu1 }
 0x33f   : > { %v1173_v44 = vpop.f32.mrb[9].mxu1  ;;  %v1182_v48 = vadd.f32 %v4158_v42, %v5700_v43  ;;  %v1208_v42 = vmax.f32 %v1158_v31, 0.0 }
 0x340   : > { %v1174_v45 = vadd.f32 %v5700_v43, %v1173_v44  ;;  %v4159_v46 = vpop.f32.mrb[10].mxu1 }
 0x341   : > { %v1176_v47 = vpop.f32.mrb[11].mxu1  ;;  %v1185_v53 = vadd.f32 %v4159_v46, %v5700_v43  ;;  %v1214_v56 = vmax.f32 %v1182_v48, 0.0  ;;  %v1166_v46 = vadd.f32 %v5693_v38, %v5700_v43 }
 0x342   : > { %v1212_v49 = vmax.f32 %v1174_v45, 0.0  ;;  %v1177_v50 = vadd.f32 %v5700_v43, %v1176_v47  ;;  %v1224_v47 = vpack.c.bf16 %v1208_v42, %v1208_v42 }
 0x343   : > { %v1215_v62 = vmax.f32 %v1185_v53, 0.0  ;;  %v1230_v3 = vpack.c.bf16 %v1214_v56, %v1214_v56 }
 0x344   : > { %v1228_v52 = vpack.c.bf16 %v1212_v49, %v1212_v49  ;;  %v1213_v54 = vmax.f32 %v1177_v50, 0.0  ;;  %v1169_v49 = vadd.f32 %v5695_v40, %v5700_v43  ;;  %v1225_v50 = vpack.c.bf16 %v1209_v41, %v1209_v41 }
 0x345   : > { %v1231_v8 = vpack.c.bf16 %v1215_v62, %v1215_v62  ;;  %v1332_v19 = vsel %vm1082_vm1, %v1230_v3, 0 }
 0x346   : > { %v1229_v57 = vpack.c.bf16 %v1213_v54, %v1213_v54  ;;  %v1240_v58 = vsel %vm1082_vm1, %v1228_v52, 0  ;;  %v4162_v59 = vpop.f32.mrb[12].mxu1  ;;  %v1210_v52 = vmax.f32 %v1166_v46, 0.0  ;;  %v1211_v38 = vmax.f32 %v1169_v49, 0.0 }
 0x347   : > { %4165 = vmatpush3.bf16.xpose.msra.mxu1 %v1240_v58  ;;  %v1189_v60 = vpop.f32.mrb[13].mxu1  ;;  %v1378_v22 = vsel %vm1082_vm1, %v1231_v8, 0  ;;  %v1198_v26 = vadd.f32 %v4162_v59, %v5700_v43 }
 0x348   : > { %v1286_v63 = vsel %vm1082_vm1, %v1229_v57, 0  ;;  %4176 = vmatprep.subr.bf16.mxu1 %v5116_v34  ;;  %v4163_v0 = vpop.f32.mrb[14].mxu1  ;;  %v1190_v5 = vadd.f32 %v5700_v43, %v1189_v60  ;;  %v1226_v40 = vpack.c.bf16 %v1210_v52, %v1210_v52 }
 0x349   : > { %4171 = vmatpush3.bf16.xpose.msra.mxu0 %v1286_v63  ;;  %v1192_v1 = vpop.f32.mrb[15].mxu1  ;;  %v1201_v32 = vadd.f32 %v4163_v0, %v5700_v43  ;;  %v1218_v36 = vmax.f32 %v1198_v26, 0.0 }
 0x34a   : > { %4182 = vmatprep.subr.bf16.mxu0 %v5116_v34  ;;  %v1193_v11 = vadd.f32 %v5700_v43, %v1192_v1  ;;  %v1216_v14 = vmax.f32 %v1190_v5, 0.0  ;;  %v1227_v43 = vpack.c.bf16 %v1211_v38, %v1211_v38 }
 0x34b   : > { %v1219_v44 = vmax.f32 %v1201_v32, 0.0  ;;  %v1234_v45 = vpack.c.bf16 %v1218_v36, %v1218_v36 }
 0x34c   : > { %v1217_v21 = vmax.f32 %v1193_v11, 0.0  ;;  %v1232_v28 = vpack.c.bf16 %v1216_v14, %v1216_v14 }
 0x34d   : > { %v1235_v48 = vpack.c.bf16 %v1219_v44, %v1219_v44  ;;  %v1516_v51 = vsel %vm1082_vm1, %v1234_v45, 0 }
 0x34e   : > { %4167 = vmatmul.mubr.msk.bf16.vlgmr.msra.gmra.mrb[16].mxu1 %vm1082_vm1, %v1220_v7  ;;  %v1233_v33 = vpack.c.bf16 %v1217_v21, %v1217_v21  ;;  %v1424_v37 = vsel %vm1082_vm1, %v1232_v28, 0 }
 0x34f   : > { %4177 = vmatpush3.bf16.xpose.msra.mxu1 %v1332_v19  ;;  %4178 = vmatprep.mubr.msk.bf16.mxu1 %vm5117_vm2, %v5116_v34  ;;  %v1562_v53 = vsel %vm1082_vm1, %v1235_v48, 0 }
 0x350   : > { %4173 = vmatmul.mubr.msk.bf16.vlgmr.msra.gmra.mrb[16].mxu0 %vm1082_vm1, %v1221_v13  ;;  %4188 = vmatprep.subr.bf16.mxu1 %v5116_v34  ;;  %v1470_v39 = vsel %vm1082_vm1, %v1233_v33, 0 }
 0x351   : > { %4183 = vmatpush3.bf16.xpose.msra.mxu0 %v1378_v22  ;;  %4184 = vmatprep.mubr.msk.bf16.mxu0 %vm5117_vm2, %v5116_v34 }
 0x352   : > { %4194 = vmatprep.subr.bf16.mxu0 %v5116_v34 }
 0x356   : > { %4179 = vmatmul.mubr.msk.bf16.vlgmr.msra.gmra.mrb[20].mxu1 %vm1082_vm1, %v1222_v29 }
 0x357   : > { %4189 = vmatpush3.bf16.xpose.msra.mxu1 %v1424_v37  ;;  %4190 = vmatprep.mubr.msk.bf16.mxu1 %vm5117_vm2, %v5116_v34 }
 0x358   : > { %4185 = vmatmul.mubr.msk.bf16.vlgmr.msra.gmra.mrb[20].mxu0 %vm1082_vm1, %v1223_v30  ;;  %4200 = vmatprep.subr.bf16.mxu1 %v5116_v34 }
 0x359   : > { %4195 = vmatpush3.bf16.xpose.msra.mxu0 %v1470_v39  ;;  %4196 = vmatprep.mubr.msk.bf16.mxu0 %vm5117_vm2, %v5116_v34 }
 0x35a   : > { %4206 = vmatprep.subr.bf16.mxu0 %v5116_v34 }
 0x35e   : > { %4191 = vmatmul.mubr.msk.bf16.vlgmr.msra.gmra.mrb[24].mxu1 %vm1082_vm1, %v1224_v47 }
 0x35f   : > { %4201 = vmatpush3.bf16.xpose.msra.mxu1 %v1516_v51  ;;  %4202 = vmatprep.mubr.msk.bf16.mxu1 %vm5117_vm2, %v5116_v34 }
 0x360   : > { %4197 = vmatmul.mubr.msk.bf16.vlgmr.msra.gmra.mrb[24].mxu0 %vm1082_vm1, %v1225_v50  ;;  %4212 = vmatprep.subr.bf16.mxu1 %v5116_v34 }
 0x361   : > { %4207 = vmatpush3.bf16.xpose.msra.mxu0 %v1562_v53  ;;  %4208 = vmatprep.mubr.msk.bf16.mxu0 %vm5117_vm2, %v5116_v34 }
 0x362   : > { %4218 = vmatprep.subr.bf16.mxu0 %v5116_v34 }
 0x366   : > { %4203 = vmatmul.mubr.msk.bf16.vlgmr.msra.gmra.mrb[28].mxu1 %vm1082_vm1, %v1226_v40 }
 0x367   : > { %4214 = vmatprep.mubr.msk.bf16.mxu1 %vm5117_vm2, %v5116_v34 }
 0x368   : > { %4209 = vmatmul.mubr.msk.bf16.vlgmr.msra.gmra.mrb[28].mxu0 %vm1082_vm1, %v1227_v43 }
 0x369   : > { %4220 = vmatprep.mubr.msk.bf16.mxu0 %vm5117_vm2, %v5116_v34 }
 0x421   : > { %v5760_v54 = vpop.f32.mrb[16].mxu1 }
 0x422   : > { %v4168_v55 = vpop.f32.mrb[17].mxu1  ;;  %v1605_v56 = vsel %vm1604_vm3, %v5760_v54, -inf }
 0x423   : > { %v5764_v57 = vpop.f32.mrb[16].mxu0  ;;  %1606 = vmax.xlane.f32.xlu0 %v1605_v56  ;;  %v1701_v58 = vrot.slane %v1605_v56, 4  ;;  %v1279_v59 = vpop.f32.mrb[18].mxu1 }
 0x424   : > { %v4169_v60 = vpop.f32.mrb[19].mxu1  ;;  %v4174_v61 = vpop.f32.mrb[17].mxu0  ;;  %v1608_v62 = vsel %vm1604_vm3, %v5764_v57, -inf }
 0x425   : > { %v1702_v63 = vmax.f32 %v1605_v56, %v1701_v58  ;;  %v1325_v0 = vpop.f32.mrb[18].mxu0  ;;  %v1707_v1 = vrot.slane %v1608_v62, 4 }
 0x426   : > { %v4175_v2 = vpop.f32.mrb[19].mxu0 }
 0x427   : > { %v1703_v3 = vrot.slane %v1702_v63, 2  ;;  %v1708_v5 = vmax.f32 %v1608_v62, %v1707_v1  ;;  %1609 = vmax.xlane.f32.xlu0 %v1608_v62 }
 0x429   : > { %v1704_v6 = vmax.f32 %v1702_v63, %v1703_v3  ;;  %v1709_v7 = vrot.slane %v1708_v5, 2  ;;  %v5768_v8 = vpop.f32.mrb[20].mxu1 }
 0x42a   : > { %v4180_v11 = vpop.f32.mrb[21].mxu1  ;;  %v1611_v12 = vsel %vm1604_vm3, %v5768_v8, -inf }
 0x42b   : > { %v1705_v13 = vrot.slane %v1704_v6, 1  ;;  %v1710_v14 = vmax.f32 %v1708_v5, %v1709_v7  ;;  %v5772_v19 = vpop.f32.mrb[20].mxu0  ;;  %1612 = vmax.xlane.f32.xlu1 %v1611_v12  ;;  %v1713_v20 = vrot.slane %v1611_v12, 4  ;;  %v1371_v21 = vpop.f32.mrb[22].mxu1 }
 0x42c   : > { %v4181_v22 = vpop.f32.mrb[23].mxu1  ;;  %v4186_v25 = vpop.f32.mrb[21].mxu0  ;;  %v1614_v26 = vsel %vm1604_vm3, %v5772_v19, -inf }
 0x42d   : > { %v5776_v28 = vmax.f32 %v1704_v6, %v1705_v13  ;;  %v1711_v29 = vrot.slane %v1710_v14, 1  ;;  %v1714_v31 = vmax.f32 %v1611_v12, %v1713_v20  ;;  %v1417_v32 = vpop.f32.mrb[22].mxu0  ;;  %v1719_v33 = vrot.slane %v1614_v26, 4 }
 0x42e   : > { %v4187_v30 = vpop.f32.mrb[23].mxu0 }
 0x42f   : > { %v1749_v35 = vsub.f32 %v5760_v54, %v5776_v28  ;;  %v5780_v36 = vmax.f32 %v1710_v14, %v1711_v29  ;;  %v1715_v37 = vrot.slane %v1714_v31, 2  ;;  %v1720_v42 = vmax.f32 %v1614_v26, %v1719_v33  ;;  %1615 = vmax.xlane.f32.xlu1 %v1614_v26 }
 0x431   : > { %v1750_v44 = vsub.f32 %v5764_v57, %v5780_v36  ;;  %v1716_v39 = vmax.f32 %v1714_v31, %v1715_v37  ;;  %v1721_v41 = vrot.slane %v1720_v42, 2  ;;  %v5784_v45 = vpop.f32.mrb[24].mxu1 }
 0x432   : > { %v4192_v46 = vpop.f32.mrb[25].mxu1  ;;  %v1617_v47 = vsel %vm1604_vm3, %v5784_v45, -inf }
 0x433   : > { %v1717_v48 = vrot.slane %v1716_v39, 1  ;;  %v1722_v49 = vmax.f32 %v1720_v42, %v1721_v41  ;;  %v5788_v50 = vpop.f32.mrb[24].mxu0  ;;  %1618 = vmax.xlane.f32.xlu0 %v1617_v47  ;;  %v1463_v51 = vpop.f32.mrb[26].mxu1  ;;  %v1725_v52 = vrot.slane %v1617_v47, 4 }
 0x434   : > { %v4193_v53 = vpop.f32.mrb[27].mxu1  ;;  %v4198_v38 = vpop.f32.mrb[25].mxu0  ;;  %v1620_v40 = vsel %vm1604_vm3, %v5788_v50, -inf }
 0x435   : > { %v5792_v43 = vmax.f32 %v1716_v39, %v1717_v48  ;;  %v1723_v55 = vrot.slane %v1722_v49, 1  ;;  %v1509_v56 = vpop.f32.mrb[26].mxu0  ;;  %v1731_v58 = vrot.slane %v1620_v40, 4  ;;  %1621 = vmax.xlane.f32.xlu1 %v1620_v40  ;;  %v1726_v59 = vmax.f32 %v1617_v47, %v1725_v52 }
 0x436   : > { %v4199_v60 = vpop.f32.mrb[27].mxu0 }
 0x437   : > { %v1751_v61 = vsub.f32 %v5768_v8, %v5792_v43  ;;  %v5796_v62 = vmax.f32 %v1722_v49, %v1723_v55  ;;  %v1732_v63 = vmax.f32 %v1620_v40, %v1731_v58  ;;  %v1727_v0 = vrot.slane %v1726_v59, 2 }
 0x439   : > { %v1752_v1 = vsub.f32 %v5772_v19, %v5796_v62  ;;  %v1733_v2 = vrot.slane %v1732_v63, 2  ;;  %v5800_v3 = vpop.f32.mrb[28].mxu1  ;;  %v1728_v5 = vmax.f32 %v1726_v59, %v1727_v0 }
 0x43a   : > { %v4204_v6 = vpop.f32.mrb[29].mxu1  ;;  %v1623_v7 = vsel %vm1604_vm3, %v5800_v3, -inf }
 0x43b   : > { %v1734_v11 = vmax.f32 %v1732_v63, %v1733_v2  ;;  %v5804_v12 = vpop.f32.mrb[28].mxu0  ;;  %1624 = vmax.xlane.f32.xlu0 %v1623_v7  ;;  %v1737_v13 = vrot.slane %v1623_v7, 4  ;;  %v1555_v14 = vpop.f32.mrb[30].mxu1  ;;  %v1729_v20 = vrot.slane %v1728_v5, 1 }
 0x43c   : > { %v4205_v21 = vpop.f32.mrb[31].mxu1  ;;  %v4210_v22 = vpop.f32.mrb[29].mxu0  ;;  %v1626_v25 = vsel %vm1604_vm3, %v5804_v12, -inf }
 0x43d   : > { %v1735_v26 = vrot.slane %v1734_v11, 1  ;;  %v1738_v29 = vmax.f32 %v1623_v7, %v1737_v13  ;;  %v1601_v31 = vpop.f32.mrb[30].mxu0  ;;  %v1743_v32 = vrot.slane %v1626_v25, 4  ;;  %1627 = vmax.xlane.f32.xlu1 %v1626_v25  ;;  %v5808_v33 = vmax.f32 %v1728_v5, %v1729_v20 }
 0x43e   : > { %v4211_v30 = vpop.f32.mrb[31].mxu0 }
 0x43f   : > { %v5810_v37 = vmax.f32 %v1734_v11, %v1735_v26  ;;  %v1739_v42 = vrot.slane %v1738_v29, 2  ;;  %v1744_v39 = vmax.f32 %v1626_v25, %v1743_v32  ;;  %v1753_v41 = vsub.f32 %v5784_v45, %v5808_v33 }
 0x441   : > { %v1754_v46 = vsub.f32 %v5788_v50, %v5810_v37  ;;  %v1740_v47 = vmax.f32 %v1738_v29, %v1739_v42  ;;  %v1745_v48 = vrot.slane %v1744_v39, 2  ;;  %v1757_v42 = vmul.f32 1.442695, %v1749_v35 }
 0x442   : > { %v1763_v35 = vmul.f32 1.442695, %v1752_v1 }
 0x443   : > { %v1741_v49 = vrot.slane %v1740_v47, 1  ;;  %v1746_v51 = vmax.f32 %v1744_v39, %v1745_v48 }
 0x445   : > { %v5816_v52 = vmax.f32 %v1740_v47, %v1741_v49  ;;  %v1747_v53 = vrot.slane %v1746_v51, 1  ;;  %v1761_v49 = vmul.f32 1.442695, %v1751_v61 }
 0x447   : > { %v1755_v38 = vsub.f32 %v5800_v3, %v5816_v52  ;;  %v5820_v40 = vmax.f32 %v1746_v51, %v1747_v53 }
 0x449   : > { %v1756_v55 = vsub.f32 %v5804_v12, %v5820_v40  ;;  %v1769_v62 = vmul.f32 1.442695, %v1755_v38 }
 0x4b0   : > { %v1607_v56 = vpop.xlane.xlu0 %1606 }
 0x4b1   : > { %v1629_v58 = vsub.f32 %v5760_v54, %v1607_v56 }
 0x4b3   : > { %v1637_v59 = vmul.f32 1.442695, %v1629_v58 }
 0x4b4   : > { %v1610_v60 = vpop.xlane.xlu0 %1609 }
 0x4b5   : > { %4621 = vpow2.f32 %v1637_v59  ;;  %v1630_v63 = vsub.f32 %v5764_v57, %v1610_v60  ;;  %v1858_v59 = vsel %vm1856_vm4, %v5641_v15, 0 }
 0x4b6   : > { %4213 = vmatpush3.bf16.msra.mxu1 %v1858_v59 }
 0x4b7   : > { %v1639_v0 = vmul.f32 1.442695, %v1630_v63  ;;  %4224 = vmatprep.subr.bf16.mxu1 %v5116_v34 }
 0x4b8   : > { %v1613_v2 = vpop.xlane.xlu1 %1612 }
 0x4b9   : > { %4623 = vpow2.f32 %v1639_v0  ;;  %v1631_v5 = vsub.f32 %v5768_v8, %v1613_v2 }
 0x4bb   : > { %v1641_v6 = vmul.f32 1.442695, %v1631_v5 }
 0x4bc   : > { %v1616_v7 = vpop.xlane.xlu1 %1615 }
 0x4bd   : > { %4625 = vpow2.f32 %v1641_v6  ;;  %v1632_v11 = vsub.f32 %v5772_v19, %v1616_v7 }
 0x4bf   : > { %v5828_v13 = vpop.eup %4621  ;;  %v1643_v14 = vmul.f32 1.442695, %v1632_v11  ;;  %v1904_v11 = vsel %vm1856_vm4, %v5644_v16, 0 }
 0x4c0   : > { %v1619_v20 = vpop.xlane.xlu0 %1618  ;;  %v1653_v21 = vsel %vm1604_vm3, %v5828_v13, 0.0  ;;  %4219 = vmatpush3.bf16.msra.mxu0 %v1904_v11 }
 0x4c1   : > { %4627 = vpow2.f32 %v1643_v14  ;;  %v1633_v22 = vsub.f32 %v5784_v45, %v1619_v20  ;;  %1654 = vadd.xlane.f32.xlu0 %v1653_v21  ;;  %v1759_v45 = vmul.f32 1.442695, %v1750_v44  ;;  %v1765_v44 = vmul.f32 1.442695, %v1753_v41  ;;  %4230 = vmatprep.subr.bf16.mxu0 %v5116_v34 }
 0x4c2   : > { %v1622_v25 = vpop.xlane.xlu1 %1621  ;;  %v1771_v41 = vmul.f32 1.442695, %v1756_v55 }
 0x4c3   : > { %v5833_v26 = vpop.eup %4623  ;;  %v1645_v29 = vmul.f32 1.442695, %v1633_v22  ;;  %v1634_v31 = vsub.f32 %v5788_v50, %v1622_v25 }
 0x4c4   : > { %v1656_v32 = vsel %vm1604_vm3, %v5833_v26, 0.0 }
 0x4c5   : > { %4629 = vpow2.f32 %v1645_v29  ;;  %v1647_v33 = vmul.f32 1.442695, %v1634_v31  ;;  %1657 = vadd.xlane.f32.xlu1 %v1656_v32 }
 0x4c7   : > { %v5838_v30 = vpop.eup %4625  ;;  %4631 = vpow2.f32 %v1647_v33 }
 0x4c8   : > { %v1625_v39 = vpop.xlane.xlu0 %1624  ;;  %v1659_v47 = vsel %vm1604_vm3, %v5838_v30, 0.0  ;;  %4633 = vpow2.f32 %v1757_v42 }
 0x4c9   : > { %v1635_v48 = vsub.f32 %v5800_v3, %v1625_v39  ;;  %1660 = vadd.xlane.f32.xlu0 %v1659_v47  ;;  %4635 = vpow2.f32 %v1759_v45  ;;  %v1767_v3 = vmul.f32 1.442695, %v1754_v46 }
 0x4ca   : > { %v1628_v51 = vpop.xlane.xlu1 %1627 }
 0x4cb   : > { %v5852_v52 = vpop.eup %4627  ;;  %v1649_v54 = vmul.f32 1.442695, %v1635_v48  ;;  %v1636_v28 = vsub.f32 %v5804_v12, %v1628_v51 }
 0x4cc   : > { %v1662_v57 = vsel %vm1604_vm3, %v5852_v52, 0.0 }
 0x4cd   : > { %4637 = vpow2.f32 %v1649_v54  ;;  %v1651_v36 = vmul.f32 1.442695, %v1636_v28  ;;  %1663 = vadd.xlane.f32.xlu1 %v1662_v57 }
 0x4ce   : > { %4639 = vpow2.f32 %v1761_v49 }
 0x4cf   : > { %v5860_v8 = vpop.eup %4629  ;;  %4641 = vpow2.f32 %v1651_v36 }
 0x4d0   : > { %v1665_v43 = vsel %vm1604_vm3, %v5860_v8, 0.0  ;;  %4643 = vpow2.f32 %v1763_v35 }
 0x4d1   : > { %v5864_v61 = vpop.eup %4631  ;;  %1666 = vadd.xlane.f32.xlu0 %v1665_v43  ;;  %4645 = vpow2.f32 %v1765_v44 }
 0x4d2   : > { %v1668_v19 = vsel %vm1604_vm3, %v5864_v61, 0.0  ;;  %v5871_v1 = vpop.eup %4633  ;;  %4647 = vpow2.f32 %v1767_v3 }
 0x4d3   : > { %1669 = vadd.xlane.f32.xlu1 %v1668_v19  ;;  %v5876_v53 = vpop.eup %4635  ;;  %4649 = vpow2.f32 %v1769_v62  ;;  %v1773_v46 = vsel %vm1604_vm3, %v5871_v1, 0.0 }
 0x4d4   : > { %4651 = vpow2.f32 %v1771_v41  ;;  %v1780_v40 = vsel %vm1604_vm3, %v5876_v53, 0.0  ;;  %v1774_v58 = vrot.slane %v1773_v46, 4 }
 0x4d5   : > { %v1781_v0 = vrot.slane %v1780_v40, 4 }
 0x4d6   : > { %v1775_v6 = vadd.f32 %v1774_v58, %v1773_v46 }
 0x4d7   : > { %v5878_v56 = vpop.eup %4637  ;;  %v1782_v20 = vadd.f32 %v1781_v0, %v1780_v40 }
 0x4d8   : > { %v5880_v50 = vpop.eup %4639  ;;  %v1671_v37 = vsel %vm1604_vm3, %v5878_v56, 0.0  ;;  %v1776_v29 = vrot.slane %v1775_v6, 2 }
 0x4d9   : > { %v5886_v38 = vpop.eup %4641  ;;  %1672 = vadd.xlane.f32.xlu0 %v1671_v37  ;;  %v1787_v60 = vsel %vm1604_vm3, %v5880_v50, 0.0  ;;  %v1783_v33 = vrot.slane %v1782_v20, 2 }
 0x4da   : > { %v1674_v12 = vsel %vm1604_vm3, %v5886_v38, 0.0  ;;  %v5892_v55 = vpop.eup %4643  ;;  %v1788_v7 = vrot.slane %v1787_v60, 4  ;;  %v1777_v47 = vadd.f32 %v1776_v29, %v1775_v6 }
 0x4db   : > { %1675 = vadd.xlane.f32.xlu1 %v1674_v12  ;;  %v5898_v63 = vpop.eup %4645  ;;  %v1794_v2 = vsel %vm1604_vm3, %v5892_v55, 0.0  ;;  %v1784_v54 = vadd.f32 %v1783_v33, %v1782_v20 }
 0x4dc   : > { %v5903_v5 = vpop.eup %4647  ;;  %v1801_v15 = vsel %vm1604_vm3, %v5898_v63, 0.0  ;;  %v1795_v21 = vrot.slane %v1794_v2, 4  ;;  %v1789_v31 = vadd.f32 %v1788_v7, %v1787_v60  ;;  %v1778_v36 = vrot.slane %v1777_v47, 1 }
 0x4dd   : > { %v5909_v14 = vpop.eup %4649  ;;  %v1808_v22 = vsel %vm1604_vm3, %v5903_v5, 0.0  ;;  %v1802_v32 = vrot.slane %v1801_v15, 4  ;;  %v1785_v19 = vrot.slane %v1784_v54, 1 }
 0x4de   : > { %v5914_v25 = vpop.eup %4651  ;;  %v1815_v16 = vsel %vm1604_vm3, %v5909_v14, 0.0  ;;  %v1796_v42 = vadd.f32 %v1795_v21, %v1794_v2  ;;  %v1809_v45 = vrot.slane %v1808_v22, 4  ;;  %v1790_v48 = vrot.slane %v1789_v31, 2 }
 0x4df   : > { %v1822_v39 = vsel %vm1604_vm3, %v5914_v25, 0.0  ;;  %v1803_v49 = vadd.f32 %v1802_v32, %v1801_v15  ;;  %v1816_v51 = vrot.slane %v1815_v16, 4  ;;  %v1779_v46 = vadd.f32 %v1778_v36, %v1777_v47 }
 0x4e0   : > { %v1797_v28 = vrot.slane %v1796_v42, 2  ;;  %v1810_v57 = vadd.f32 %v1809_v45, %v1808_v22  ;;  %v1823_v35 = vrot.slane %v1822_v39, 4  ;;  %v1791_v44 = vadd.f32 %v1790_v48, %v1789_v31 }
 0x4e1   : > { %v1804_v43 = vrot.slane %v1803_v49, 2  ;;  %v1817_v3 = vadd.f32 %v1816_v51, %v1815_v16  ;;  %v1786_v59 = vadd.f32 %v1785_v19, %v1784_v54  ;;  %4653 = vrcp.f32 %v1779_v46 }
 0x4e2   : > { %v1798_v62 = vadd.f32 %v1797_v28, %v1796_v42  ;;  %v1811_v41 = vrot.slane %v1810_v57, 2  ;;  %v1824_v37 = vadd.f32 %v1823_v35, %v1822_v39  ;;  %v1792_v12 = vrot.slane %v1791_v44, 1 }
 0x4e3   : > { %v1805_v40 = vadd.f32 %v1804_v43, %v1803_v49  ;;  %v1818_v58 = vrot.slane %v1817_v3, 2  ;;  %4655 = vrcp.f32 %v1786_v59 }
 0x4e4   : > { %v1799_v60 = vrot.slane %v1798_v62, 1  ;;  %v1812_v0 = vadd.f32 %v1811_v41, %v1810_v57  ;;  %v1825_v2 = vrot.slane %v1824_v37, 2  ;;  %v1793_v6 = vadd.f32 %v1792_v12, %v1791_v44 }
 0x4e5   : > { %v1806_v7 = vrot.slane %v1805_v40, 1  ;;  %v1819_v11 = vadd.f32 %v1818_v58, %v1817_v3 }
 0x4e6   : > { %v1800_v15 = vadd.f32 %v1799_v60, %v1798_v62  ;;  %v1813_v20 = vrot.slane %v1812_v0, 1  ;;  %v1826_v21 = vadd.f32 %v1825_v2, %v1824_v37  ;;  %4657 = vrcp.f32 %v1793_v6 }
 0x4e7   : > { %v1807_v22 = vadd.f32 %v1806_v7, %v1805_v40  ;;  %v1820_v29 = vrot.slane %v1819_v11, 1 }
 0x4e8   : > { %4659 = vrcp.f32 %v1800_v15  ;;  %v1814_v31 = vadd.f32 %v1813_v20, %v1812_v0  ;;  %v1827_v32 = vrot.slane %v1826_v21, 1 }
 0x4e9   : > { %4661 = vrcp.f32 %v1807_v22  ;;  %v1821_v16 = vadd.f32 %v1820_v29, %v1819_v11  ;;  %v4686_v11 = vld [vmem:[%s5596_s3 + $0xc] sm:$0xf]  ;;  %v4687_v22 = vld [vmem:[%s5596_s3 + $0x10] sm:$0xf] }
 0x4ea   : > { %4663 = vrcp.f32 %v1814_v31  ;;  %v1828_v42 = vadd.f32 %v1827_v32, %v1826_v21  ;;  %v1996_v15 = vsel %vm1856_vm4, %v4686_v11, 0  ;;  %v2042_v29 = vsel %vm1856_vm4, %v4687_v22, 0  ;;  %v4598_v11 = vld [vmem:[#allocation11 + $0x8] sm:$0xff]  }
 0x4eb   : > { %v4654_v33 = vpop.eup %4653  ;;  %4665 = vrcp.f32 %v1821_v16 }
 0x4ec   : > { %v1837_v39 = vmul.f32 %v4654_v33, %v5871_v1  ;;  %4667 = vrcp.f32 %v1828_v42  ;;  %v4688_v42 = vld [vmem:[%s5596_s3 + $0x14] sm:$0xf] }
 0x4ed   : > { %v4656_v45 = vpop.eup %4655 }
 0x4ee   : > { %v1838_v48 = vmul.f32 %v4656_v45, %v5876_v53  ;;  %v1845_v51 = vpack.c.bf16 %v1837_v39, %v1837_v39  ;;  %v2088_v45 = vsel %vm1856_vm4, %v4688_v42, 0 }
 0x4f0   : > { %v4658_v47 = vpop.eup %4657  ;;  %v1846_v57 = vpack.c.bf16 %v1838_v48, %v1838_v48 }
 0x4f1   : > { %v1839_v54 = vmul.f32 %v4658_v47, %v5880_v50 }
 0x4f2   : > { %v4660_v49 = vpop.eup %4659 }
 0x4f3   : > { %v4662_v28 = vpop.eup %4661  ;;  %v1840_v35 = vmul.f32 %v4660_v49, %v5892_v55  ;;  %v1847_v44 = vpack.c.bf16 %v1839_v54, %v1839_v54 }
 0x4f4   : > { %v4664_v36 = vpop.eup %4663  ;;  %v1841_v43 = vmul.f32 %v4662_v28, %v5898_v63  ;;  %v4690_v28 = vld [vmem:[%s5596_s3 + $0x1c] sm:$0xf] }
 0x4f5   : > { %v4666_v3 = vpop.eup %4665  ;;  %v1848_v1 = vpack.c.bf16 %v1840_v35, %v1840_v35  ;;  %v1842_v19 = vmul.f32 %v4664_v36, %v5903_v5 }
 0x4f6   : > { %v4668_v53 = vpop.eup %4667  ;;  %v1849_v62 = vpack.c.bf16 %v1841_v43, %v1841_v43  ;;  %v1843_v50 = vmul.f32 %v4666_v3, %v5909_v14  ;;  %v4691_v3 = vld [vmem:[%s5589_s9] sm:$0xf] }
 0x4f7   : > { %v1850_v41 = vpack.c.bf16 %v1842_v19, %v1842_v19  ;;  %v1844_v37 = vmul.f32 %v4668_v53, %v5914_v25  ;;  %v4685_v25 = vld [vmem:[%s5596_s3 + $0x8] sm:$0xf]  ;;  %v4692_v19 = vld [vmem:[%s5589_s9 + $0x4] sm:$0xf] }
 0x4f8   : > { %v1851_v55 = vpack.c.bf16 %v1843_v50, %v1843_v50  ;;  %v1950_v60 = vsel %vm1856_vm4, %v4685_v25, 0  ;;  %v2304_v53 = vsel %vm1856_vm4, %v4692_v19, 0 }
 0x4f9   : > { %v1852_v46 = vpack.c.bf16 %v1844_v37, %v1844_v37  ;;  %v4694_v37 = vld [vmem:[%s5589_s9 + $0xc] sm:$0xf] }
 0x506   : > { %2222 = vxpose.xlu0.c.b16.start.end [1/1] (short) (narrow) %v1845_v51, 16  ;;  %v4689_v51 = vld [vmem:[%s5596_s3 + $0x18] sm:$0xf]  ;;  %s5118_s3 = smov [#allocation20]  }
 0x507   : > { %v2134_v54 = vsel %vm1856_vm4, %v4689_v51, 0  ;;  %s5015_s23 = sshll.u32 %s5118_s3, 4  ;;  %s5016_s23 = int_to_ptr.vmem [resolvable:$false] %s5015_s23 }
 0x508   : > { %2284 = vxpose.xlu1.c.b16.start.end [1/1] (short) (narrow) %v1846_v57, 16  ;;  %v2180_v57 = vsel %vm1856_vm4, %v4690_v28, 0  ;;  %p5018_p11 = scmp.lt.s32.totalorder %s6163_s14, %s5016_s23 }
 0x50a   : > { %2346 = vxpose.xlu0.c.b16.start.end [1/1] (short) (narrow) %v1847_v44, 16 }
 0x50c   : > { %2408 = vxpose.xlu1.c.b16.start.end [1/1] (short) (narrow) %v1848_v1, 16  ;;  %v2242_v1 = vsel %vm1856_vm4, %v4691_v3, 0 }
 0x50e   : > { %2470 = vxpose.xlu0.c.b16.start.end [1/1] (short) (narrow) %v1849_v62, 16  ;;  %v4693_v62 = vld [vmem:[%s5589_s9 + $0x8] sm:$0xf] }
 0x50f   : > { %v2366_v50 = vsel %vm1856_vm4, %v4693_v62, 0 }
 0x510   : > { %2532 = vxpose.xlu1.c.b16.start.end [1/1] (short) (narrow) %v1850_v41, 16 }
 0x512   : > { %2594 = vxpose.xlu0.c.b16.start.end [1/1] (short) (narrow) %v1851_v55, 16  ;;  %v2428_v55 = vsel %vm1856_vm4, %v4694_v37, 0 }
 0x514   : > { %2656 = vxpose.xlu1.c.b16.start.end [1/1] (short) (narrow) %v1852_v46, 16 }
 0x54e   : > { %v1655_v63 = vpop.xlane.xlu0 %1654 }
 0x54f   : > { %4669 = vrcp.f32 %v1655_v63  ;;  %v4695_v63 = vld [vmem:[%s5589_s9 + $0x10] sm:$0xf] }
 0x552   : > { %v1658_v12 = vpop.xlane.xlu1 %1657 }
 0x553   : > { %4671 = vrcp.f32 %v1658_v12  ;;  %v2490_v12 = vsel %vm1856_vm4, %v4695_v63, 0 }
 0x556   : > { %v1661_v5 = vpop.xlane.xlu0 %1660 }
 0x557   : > { %4673 = vrcp.f32 %v1661_v5 }
 0x559   : > { %v4670_v40 = vpop.eup %4669 }
 0x55a   : > { %v1685_v14 = vmul.f32 %v4670_v40, %v5828_v13  ;;  %v1664_v58 = vpop.xlane.xlu1 %1663  ;;  %v4696_v40 = vld [vmem:[%s5589_s9 + $0x14] sm:$0xf] }
 0x55b   : > { %4675 = vrcp.f32 %v1664_v58 }
 0x55c   : > { %v1693_v59 = vpack.c.bf16 %v1685_v14, %v1685_v14  ;;  %v2552_v14 = vsel %vm1856_vm4, %v4696_v40, 0 }
 0x55d   : > { %v4672_v0 = vpop.eup %4671 }
 0x55e   : > { %v1686_v2 = vmul.f32 %v4672_v0, %v5833_v26  ;;  %4215 = vmatmul.mubr.msk.bf16.vlgmr.msra.gmra.mrb[32].mxu1 %vm1604_vm3, %v1693_v59  ;;  %v1667_v6 = vpop.xlane.xlu0 %1666  ;;  %v4697_v59 = vld [vmem:[%s5589_s9 + $0x18] sm:$0xf]  ;;  %v4698_v0 = vld [vmem:[%s5589_s9 + $0x1c] sm:$0xf]  ;;  %s6294_s9 = sld [smem:[#allocation46_spill]] }
 0x55f   : > { %4677 = vrcp.f32 %v1667_v6  ;;  %4225 = vmatpush3.bf16.msra.mxu1 %v1950_v60  ;;  %4226 = vmatprep.mubr.msk.bf16.mxu1 %vm5117_vm2, %v5116_v34  ;;  %v2614_v25 = vsel %vm1856_vm4, %v4697_v59, 0 }
 0x560   : > { %v1670_v7 = vpop.xlane.xlu1 %1669  ;;  %v1694_v13 = vpack.c.bf16 %v1686_v2, %v1686_v2  ;;  %4236 = vmatprep.subr.bf16.mxu1 %v5116_v34  ;;  %v2676_v2 = vsel %vm1856_vm4, %v4698_v0, 0 }
 0x561   : > { %v4674_v20 = vpop.eup %4673  ;;  %4679 = vrcp.f32 %v1670_v7 }
 0x562   : > { %v1687_v26 = vmul.f32 %v4674_v20, %v5838_v30  ;;  %4221 = vmatmul.mubr.msk.bf16.vlgmr.msra.gmra.mrb[32].mxu0 %vm1604_vm3, %v1694_v13  ;;  %v4597_v13 = vld [vmem:[#allocation11] sm:$0xff]  }
 0x563   : > { %4231 = vmatpush3.bf16.msra.mxu0 %v1996_v15  ;;  %4232 = vmatprep.mubr.msk.bf16.mxu0 %vm5117_vm2, %v5116_v34  ;;  %v4599_v15 = vld [vmem:[#allocation10] sm:$0xff]   ;;  %v4601_v20 = vld [vmem:[%s6289_s11] sm:$0xff]  }
 0x564   : > { %v1695_v21 = vpack.c.bf16 %v1687_v26, %v1687_v26  ;;  %4242 = vmatprep.subr.bf16.mxu0 %v5116_v34  ;;  %v4602_v26 = vld [vmem:[%s6289_s11 + $0x8] sm:$0xff]   ;;  %s6161_s0 = scalar_lea.hbm %s6294_s9, %s3993_s10 }
 0x565   : > { %v4676_v31 = vpop.eup %4675 }
 0x566   : > { %v1688_v32 = vmul.f32 %v4676_v31, %v5852_v52  ;;  %4227 = vmatmul.mubr.msk.bf16.vlgmr.msra.gmra.mrb[36].mxu1 %vm1604_vm3, %v1695_v21  ;;  %v1673_v16 = vpop.xlane.xlu0 %1672 }
 0x567   : > { %4681 = vrcp.f32 %v1673_v16  ;;  %4237 = vmatpush3.bf16.msra.mxu1 %v2042_v29  ;;  %4238 = vmatprep.mubr.msk.bf16.mxu1 %vm5117_vm2, %v5116_v34 }
 0x568   : > { %v1676_v30 = vpop.xlane.xlu1 %1675  ;;  %v1696_v33 = vpack.c.bf16 %v1688_v32, %v1688_v32  ;;  %4248 = vmatprep.subr.bf16.mxu1 %v5116_v34 }
 0x569   : > { %v4678_v39 = vpop.eup %4677  ;;  %4683 = vrcp.f32 %v1676_v30 }
 0x56a   : > { %v1689_v52 = vmul.f32 %v4678_v39, %v5860_v8  ;;  %4233 = vmatmul.mubr.msk.bf16.vlgmr.msra.gmra.mrb[36].mxu0 %vm1604_vm3, %v1696_v33 }
 0x56b   : > { %v4680_v47 = vpop.eup %4679  ;;  %4243 = vmatpush3.bf16.msra.mxu0 %v2088_v45  ;;  %4244 = vmatprep.mubr.msk.bf16.mxu0 %vm5117_vm2, %v5116_v34 }
 0x56c   : > { %v1690_v48 = vmul.f32 %v4680_v47, %v5864_v61  ;;  %v1697_v49 = vpack.c.bf16 %v1689_v52, %v1689_v52  ;;  %4254 = vmatprep.subr.bf16.mxu0 %v5116_v34 }
 0x56e   : > { %4239 = vmatmul.mubr.msk.bf16.vlgmr.msra.gmra.mrb[40].mxu1 %vm1604_vm3, %v1697_v49  ;;  %v1698_v8 = vpack.c.bf16 %v1690_v48, %v1690_v48  ;;  %v2292_v41 = vpop.trf.xlu1 }
 0x56f   : > { %4249 = vmatpush3.bf16.msra.mxu1 %v2134_v54  ;;  %4250 = vmatprep.mubr.msk.bf16.mxu1 %vm5117_vm2, %v5116_v34  ;;  %v4600_v54 = vld [vmem:[#allocation10 + $0x8] sm:$0xff]  }
 0x570   : > { %4260 = vmatprep.subr.bf16.mxu1 %v5116_v34 }
 0x571   : > { %v4682_v61 = vpop.eup %4681 }
 0x572   : > { %v1691_v35 = vmul.f32 %v4682_v61, %v5878_v56  ;;  %4245 = vmatmul.mubr.msk.bf16.vlgmr.msra.gmra.mrb[40].mxu0 %vm1604_vm3, %v1698_v8  ;;  %v2416_v5 = vpop.trf.xlu1 }
 0x573   : > { %v4684_v36 = vpop.eup %4683  ;;  %4255 = vmatpush3.bf16.msra.mxu0 %v2180_v57  ;;  %4256 = vmatprep.mubr.msk.bf16.mxu0 %vm5117_vm2, %v5116_v34 }
 0x574   : > { %v1692_v44 = vmul.f32 %v4684_v36, %v5886_v38  ;;  %v1699_v43 = vpack.c.bf16 %v1691_v35, %v1691_v35  ;;  %4266 = vmatprep.subr.bf16.mxu0 %v5116_v34  ;;  %v2230_v38 = vpop.trf.xlu0 }
 0x576   : > { %4251 = vmatmul.mubr.msk.bf16.vlgmr.msra.gmra.mrb[44].mxu1 %vm1604_vm3, %v1699_v43  ;;  %v1700_v56 = vpack.c.bf16 %v1692_v44, %v1692_v44  ;;  %v2540_v60 = vpop.trf.xlu1 }
 0x577   : > { %4261 = vmatpush3.bf16.msra.mxu1 %v2242_v1  ;;  %4262 = vmatprep.mubr.msk.bf16.mxu1 %vm5117_vm2, %v5116_v34 }
 0x578   : > { %4272 = vmatprep.subr.bf16.mxu1 %v5116_v34  ;;  %v2354_v46 = vpop.trf.xlu0 }
 0x57a   : > { %4257 = vmatmul.mubr.msk.bf16.vlgmr.msra.gmra.mrb[44].mxu0 %vm1604_vm3, %v1700_v56  ;;  %v2664_v7 = vpop.trf.xlu1 }
 0x57b   : > { %4267 = vmatpush3.bf16.msra.mxu0 %v2304_v53  ;;  %4268 = vmatprep.mubr.msk.bf16.mxu0 %vm5117_vm2, %v5116_v34 }
 0x57c   : > { %4278 = vmatprep.subr.bf16.mxu0 %v5116_v34  ;;  %v2478_v58 = vpop.trf.xlu0 }
 0x57e   : > { %4263 = vmatmul.mubr.msk.bf16.vlgmr.msra.gmra.mrb[48].mxu1 %vm1604_vm3, %v2230_v38 }
 0x57f   : > { %4273 = vmatpush3.bf16.msra.mxu1 %v2366_v50  ;;  %4274 = vmatprep.mubr.msk.bf16.mxu1 %vm5117_vm2, %v5116_v34 }
 0x580   : > { %4284 = vmatprep.subr.bf16.mxu1 %v5116_v34  ;;  %v2602_v6 = vpop.trf.xlu0 }
 0x582   : > { %4269 = vmatmul.mubr.msk.bf16.vlgmr.msra.gmra.mrb[48].mxu0 %vm1604_vm3, %v2292_v41 }
 0x583   : > { %4279 = vmatpush3.bf16.msra.mxu0 %v2428_v55  ;;  %4280 = vmatprep.mubr.msk.bf16.mxu0 %vm5117_vm2, %v5116_v34 }
 0x584   : > { %4290 = vmatprep.subr.bf16.mxu0 %v5116_v34 }
 0x586   : > { %4275 = vmatmul.mubr.msk.bf16.vlgmr.msra.gmra.mrb[52].mxu1 %vm1604_vm3, %v2354_v46 }
 0x587   : > { %4285 = vmatpush3.bf16.msra.mxu1 %v2490_v12  ;;  %4286 = vmatprep.mubr.msk.bf16.mxu1 %vm5117_vm2, %v5116_v34 }
 0x588   : > { %4296 = vmatprep.subr.bf16.mxu1 %v5116_v34 }
 0x58a   : > { %4281 = vmatmul.mubr.msk.bf16.vlgmr.msra.gmra.mrb[52].mxu0 %vm1604_vm3, %v2416_v5 }
 0x58b   : > { %4291 = vmatpush3.bf16.msra.mxu0 %v2552_v14  ;;  %4292 = vmatprep.mubr.msk.bf16.mxu0 %vm5117_vm2, %v5116_v34 }
 0x58c   : > { %4302 = vmatprep.subr.bf16.mxu0 %v5116_v34 }
 0x58e   : > { %4287 = vmatmul.mubr.msk.bf16.vlgmr.msra.gmra.mrb[56].mxu1 %vm1604_vm3, %v2478_v58 }
 0x58f   : > { %4297 = vmatpush3.bf16.msra.mxu1 %v2614_v25  ;;  %4298 = vmatprep.mubr.msk.bf16.mxu1 %vm5117_vm2, %v5116_v34 }
 0x590   : > { %4308 = vmatprep.subr.bf16.mxu1 %v4597_v13 }
 0x592   : > { %4293 = vmatmul.mubr.msk.bf16.vlgmr.msra.gmra.mrb[56].mxu0 %vm1604_vm3, %v2540_v60 }
 0x593   : > { %4303 = vmatpush3.bf16.msra.mxu0 %v2676_v2  ;;  %4304 = vmatprep.mubr.msk.bf16.mxu0 %vm5117_vm2, %v5116_v34 }
 0x594   : > { %4348 = vmatprep.subr.bf16.mxu0 %v4601_v20 }
 0x596   : > { %4299 = vmatmul.mubr.msk.bf16.vlgmr.msra.gmra.mrb[60].mxu1 %vm1604_vm3, %v2602_v6 }
 0x597   : > { %4309 = vmatpush3.bf16.msra.mxu1 %v4597_v13 }
 0x598   : > { %4310 = vmatprep.subr.bf16.mxu1 %v4598_v11 }
 0x59a   : > { %4305 = vmatmul.mubr.msk.bf16.vlgmr.msra.gmra.mrb[60].mxu0 %vm1604_vm3, %v2664_v7 }
 0x59b   : > { %4311 = vmatpush3.bf16.msra.mxu1 %v4598_v11  ;;  %4349 = vmatpush3.bf16.msra.mxu0 %v4601_v20 }
 0x59c   : > { %4328 = vmatprep.subr.bf16.mxu1 %v4599_v15  ;;  %4350 = vmatprep.subr.bf16.mxu0 %v4602_v26 }
 0x59f   : > { %4351 = vmatpush3.bf16.msra.mxu0 %v4602_v26 }
 0x631   : > { %v1894_v21 = vpop.f32.mrb[32].mxu1 }
 0x632   : > { %v4216_v22 = vpop.f32.mrb[33].mxu1 }
 0x633   : > { %v1897_v29 = vpop.f32.mrb[34].mxu1 }
 0x634   : > { %v4217_v31 = vpop.f32.mrb[35].mxu1 }
 0x635   : > { %v1940_v32 = vpop.f32.mrb[32].mxu0 }
 0x636   : > { %v2718_v16 = vpack.c.bf16 %v1940_v32, %v1894_v21  ;;  %v4222_v30 = vpop.f32.mrb[33].mxu0 }
 0x637   : > { %v1943_v33 = vpop.f32.mrb[34].mxu0 }
 0x638   : > { %v4223_v42 = vpop.f32.mrb[35].mxu0  ;;  %4312 = vmatprep.mubr.msk.bf16.mxu1 %vm906_vm0, %v2718_v16 }
 0x639   : > { %v1986_v45 = vpop.f32.mrb[36].mxu1 }
 0x63a   : > { %v4228_v39 = vpop.f32.mrb[37].mxu1 }
 0x63b   : > { %v1989_v52 = vpop.f32.mrb[38].mxu1 }
 0x63c   : > { %v4229_v47 = vpop.f32.mrb[39].mxu1 }
 0x63d   : > { %v2032_v48 = vpop.f32.mrb[36].mxu0 }
 0x63e   : > { %v2719_v49 = vpack.c.bf16 %v2032_v48, %v1986_v45  ;;  %v4234_v51 = vpop.f32.mrb[37].mxu0 }
 0x63f   : > { %v2035_v8 = vpop.f32.mrb[38].mxu0 }
 0x640   : > { %v4235_v28 = vpop.f32.mrb[39].mxu0  ;;  %4313 = vmatmul.mubr.msk.bf16.vlgmr.msra.gmra.mrb[64].mxu1 %vm906_vm0, %v2719_v49 }
 0x641   : > { %v2078_v57 = vpop.f32.mrb[40].mxu1  ;;  %4329 = vmatpush3.bf16.msra.mxu1 %v4599_v15 }
 0x642   : > { %v4240_v61 = vpop.f32.mrb[41].mxu1  ;;  %4330 = vmatprep.subr.bf16.mxu1 %v4600_v54 }
 0x643   : > { %v2081_v35 = vpop.f32.mrb[42].mxu1 }
 0x644   : > { %v4241_v36 = vpop.f32.mrb[43].mxu1 }
 0x645   : > { %v2124_v44 = vpop.f32.mrb[40].mxu0  ;;  %4331 = vmatpush3.bf16.msra.mxu1 %v4600_v54 }
 0x646   : > { %v2720_v43 = vpack.c.bf16 %v2124_v44, %v2078_v57  ;;  %v4246_v3 = vpop.f32.mrb[41].mxu0  ;;  %4396 = vmatprep.subr.bf16.mxu1 %v5116_v34 }
 0x647   : > { %v2127_v1 = vpop.f32.mrb[42].mxu0 }
 0x648   : > { %v4247_v56 = vpop.f32.mrb[43].mxu0  ;;  %4316 = vmatprep.mubr.msk.bf16.mxu1 %vm906_vm0, %v2720_v43 }
 0x649   : > { %v2170_v19 = vpop.f32.mrb[44].mxu1 }
 0x64a   : > { %v4252_v53 = vpop.f32.mrb[45].mxu1 }
 0x64b   : > { %v2173_v38 = vpop.f32.mrb[46].mxu1 }
 0x64c   : > { %v4253_v62 = vpop.f32.mrb[47].mxu1 }
 0x64d   : > { %v2216_v50 = vpop.f32.mrb[44].mxu0 }
 0x64e   : > { %v2721_v41 = vpack.c.bf16 %v2216_v50, %v2170_v19  ;;  %v4258_v37 = vpop.f32.mrb[45].mxu0 }
 0x64f   : > { %v2219_v55 = vpop.f32.mrb[46].mxu0 }
 0x650   : > { %v4259_v46 = vpop.f32.mrb[47].mxu0  ;;  %4317 = vmatmul.mubr.msk.bf16.gmra.mrb[68].mxu1 %vm906_vm0, %v2721_v41 }
 0x651   : > { %v2278_v63 = vpop.f32.mrb[48].mxu1 }
 0x652   : > { %v4264_v12 = vpop.f32.mrb[49].mxu1 }
 0x653   : > { %v2281_v5 = vpop.f32.mrb[50].mxu1 }
 0x654   : > { %v4265_v40 = vpop.f32.mrb[51].mxu1 }
 0x655   : > { %v2340_v14 = vpop.f32.mrb[48].mxu0 }
 0x656   : > { %v2722_v58 = vpack.c.bf16 %v2340_v14, %v2278_v63  ;;  %v4270_v59 = vpop.f32.mrb[49].mxu0 }
 0x657   : > { %v2343_v25 = vpop.f32.mrb[50].mxu0 }
 0x658   : > { %v4271_v60 = vpop.f32.mrb[51].mxu0  ;;  %4320 = vmatprep.mubr.msk.bf16.mxu1 %vm906_vm0, %v2722_v58 }
 0x659   : > { %v2402_v0 = vpop.f32.mrb[52].mxu1 }
 0x65a   : > { %v4276_v2 = vpop.f32.mrb[53].mxu1 }
 0x65b   : > { %v2405_v6 = vpop.f32.mrb[54].mxu1 }
 0x65c   : > { %v4277_v7 = vpop.f32.mrb[55].mxu1 }
 0x65d   : > { %v2464_v13 = vpop.f32.mrb[52].mxu0 }
 0x65e   : > { %v2723_v11 = vpack.c.bf16 %v2464_v13, %v2402_v0  ;;  %v4282_v15 = vpop.f32.mrb[53].mxu0 }
 0x65f   : > { %v2467_v20 = vpop.f32.mrb[54].mxu0 }
 0x660   : > { %v4283_v26 = vpop.f32.mrb[55].mxu0  ;;  %4321 = vmatmul.mubr.msk.bf16.gmra.mrb[72].mxu1 %vm906_vm0, %v2723_v11 }
 0x661   : > { %v2526_v21 = vpop.f32.mrb[56].mxu1 }
 0x662   : > { %v4288_v22 = vpop.f32.mrb[57].mxu1 }
 0x663   : > { %v2529_v29 = vpop.f32.mrb[58].mxu1 }
 0x664   : > { %v4289_v31 = vpop.f32.mrb[59].mxu1 }
 0x665   : > { %v2588_v32 = vpop.f32.mrb[56].mxu0 }
 0x666   : > { %v2724_v16 = vpack.c.bf16 %v2588_v32, %v2526_v21  ;;  %v4294_v30 = vpop.f32.mrb[57].mxu0 }
 0x667   : > { %v2591_v33 = vpop.f32.mrb[58].mxu0 }
 0x668   : > { %v4295_v42 = vpop.f32.mrb[59].mxu0  ;;  %4324 = vmatprep.mubr.msk.bf16.mxu1 %vm906_vm0, %v2724_v16 }
 0x669   : > { %v2650_v45 = vpop.f32.mrb[60].mxu1 }
 0x66a   : > { %v4300_v39 = vpop.f32.mrb[61].mxu1 }
 0x66b   : > { %v2653_v52 = vpop.f32.mrb[62].mxu1 }
 0x66c   : > { %v4301_v47 = vpop.f32.mrb[63].mxu1 }
 0x66d   : > { %v2712_v48 = vpop.f32.mrb[60].mxu0 }
 0x66e   : > { %v2725_v49 = vpack.c.bf16 %v2712_v48, %v2650_v45  ;;  %v4306_v51 = vpop.f32.mrb[61].mxu0 }
 0x66f   : > { %v2715_v54 = vpop.f32.mrb[62].mxu0  ;;  %v4606_v51 = vld [vmem:[#allocation16 + $0x8] sm:$0xff]  }
 0x670   : > { %4325 = vmatmul.mubr.msk.bf16.gmra.mrb[76].mxu1 %vm906_vm0, %v2725_v49  ;;  %v4307_v8 = vpop.f32.mrb[63].mxu0  ;;  %v4605_v49 = vld [vmem:[#allocation16] sm:$0xff]   ;;  %v4607_v54 = vld [vmem:[#allocation16 + $0x10] sm:$0xff]  }
 0x671   : > { %4332 = vmatprep.mubr.msk.bf16.mxu1 %vm906_vm0, %v5624_v4  ;;  %v4603_v4 = vld [vmem:[%s6289_s11 + $0x10] sm:$0xff]  }
 0x672   : > { %4352 = vmatprep.subr.bf16.mxu0 %v4603_v4  ;;  %v4608_v8 = vld [vmem:[#allocation16 + $0x18] sm:$0xff]  }
 0x673   : > { %4353 = vmatpush3.bf16.msra.mxu0 %v4603_v4  ;;  %v6077_v4 = vld [vmem:[%s6290_s20] ss:$0 sm:$0xff]  ;;  %s3657_s20 = scalar_lea.sflag [#allocation4], %s5585_s5 }
 0x678   : > { %4333 = vmatmul.mubr.msk.bf16.vlgmr.msra.gmra.mrb[64].mxu1 %vm906_vm0, %v5632_v9  ;;  %v4604_v9 = vld [vmem:[%s6289_s11 + $0x18] sm:$0xff]  }
 0x679   : > { %4336 = vmatprep.mubr.msk.bf16.mxu1 %vm906_vm0, %v5634_v10  ;;  %4354 = vmatprep.subr.bf16.mxu0 %v4604_v9  ;;  %v3955_v10 = vld [vmem:[#allocation13] ss:$0 sm:$0xff] }
 0x67a   : > { %4355 = vmatpush3.bf16.msra.mxu0 %v4604_v9 }
 0x67b   : > { %4372 = vmatprep.subr.bf16.mxu0 %v5116_v34 }
 0x680   : > { %4337 = vmatmul.mubr.msk.bf16.gmra.mrb[68].mxu1 %vm906_vm0, %v5648_v17 }
 0x681   : > { %4340 = vmatprep.mubr.msk.bf16.mxu1 %vm906_vm0, %v5652_v18 }
 0x688   : > { %4341 = vmatmul.mubr.msk.bf16.gmra.mrb[72].mxu1 %vm906_vm0, %v5662_v23 }
 0x689   : > { %4344 = vmatprep.mubr.msk.bf16.mxu1 %vm906_vm0, %v5664_v24 }
 0x690   : > { %4345 = vmatmul.mubr.msk.bf16.gmra.mrb[76].mxu1 %vm906_vm0, %v5672_v27 }
 0x691   : > { %4404 = vmatprep.mubr.msk.bf16.mxu1 %vm5117_vm2, %v5116_v34 }
 0x74b   : > { %v4334_v17 = vpop.f32.mrb[64].mxu1 }
 0x74c   : > { %v2976_v18 = vadd.f32 %v4334_v17, %v3955_v10  ;;  %v2905_v23 = vpop.f32.mrb[65].mxu1 }
 0x74d   : > { %v2974_v24 = vadd.f32 %v3955_v10, %v2905_v23  ;;  %v4335_v27 = vpop.f32.mrb[66].mxu1 }
 0x74e   : > { %v2977_v28 = vadd.f32 %v4335_v27, %v3955_v10  ;;  %v2908_v57 = vpop.f32.mrb[67].mxu1  ;;  %v2992_v35 = vmax.f32 %v2976_v18, 0.0 }
 0x74f   : > { %v2975_v61 = vadd.f32 %v3955_v10, %v2908_v57  ;;  %v2990_v44 = vmax.f32 %v2974_v24, 0.0 }
 0x750   : > { %v2993_v36 = vmax.f32 %v2977_v28, 0.0 }
 0x751   : > { %v2991_v43 = vmax.f32 %v2975_v61, 0.0 }
 0x752   : > { %v3007_v3 = vpack.c.bf16 %v2993_v36, %v2992_v35 }
 0x753   : > { %v3006_v1 = vpack.c.bf16 %v2991_v43, %v2990_v44  ;;  %v4338_v56 = vpop.f32.mrb[68].mxu1 }
 0x754   : > { %v2980_v19 = vadd.f32 %v4338_v56, %v3955_v10  ;;  %v2921_v53 = vpop.f32.mrb[69].mxu1 }
 0x755   : > { %v2978_v38 = vadd.f32 %v3955_v10, %v2921_v53  ;;  %v4339_v62 = vpop.f32.mrb[70].mxu1  ;;  %4356 = vmatprep.mubr.msk.bf16.mxu0 %vm1082_vm1, %v3006_v1 }
 0x756   : > { %v2981_v50 = vadd.f32 %v4339_v62, %v3955_v10  ;;  %v2924_v41 = vpop.f32.mrb[71].mxu1  ;;  %4357 = vmatmul.mubr.msk.bf16.vlgmr.msra.gmra.mrb[64].mxu0 %vm1082_vm1, %v3007_v3  ;;  %v2996_v55 = vmax.f32 %v2980_v19, 0.0 }
 0x757   : > { %v2979_v37 = vadd.f32 %v3955_v10, %v2924_v41  ;;  %v2994_v63 = vmax.f32 %v2978_v38, 0.0  ;;  %4373 = vmatpush3.bf16.msra.mxu0 %v4605_v49 }
 0x758   : > { %v2997_v46 = vmax.f32 %v2981_v50, 0.0  ;;  %4374 = vmatprep.subr.bf16.mxu0 %v5116_v34 }
 0x759   : > { %v2995_v12 = vmax.f32 %v2979_v37, 0.0 }
 0x75a   : > { %v3009_v5 = vpack.c.bf16 %v2997_v46, %v2996_v55 }
 0x75b   : > { %v3008_v40 = vpack.c.bf16 %v2995_v12, %v2994_v63  ;;  %v4342_v14 = vpop.f32.mrb[72].mxu1  ;;  %4375 = vmatpush3.bf16.msra.mxu0 %v4606_v51 }
 0x75c   : > { %v2984_v58 = vadd.f32 %v4342_v14, %v3955_v10  ;;  %v2937_v59 = vpop.f32.mrb[73].mxu1  ;;  %4376 = vmatprep.subr.bf16.mxu0 %v5116_v34 }
 0x75d   : > { %v2982_v25 = vadd.f32 %v3955_v10, %v2937_v59  ;;  %v4343_v60 = vpop.f32.mrb[74].mxu1  ;;  %4360 = vmatprep.mubr.msk.bf16.mxu0 %vm1082_vm1, %v3008_v40 }
 0x75e   : > { %v2985_v0 = vadd.f32 %v4343_v60, %v3955_v10  ;;  %v2940_v2 = vpop.f32.mrb[75].mxu1  ;;  %4361 = vmatmul.mubr.msk.bf16.gmra.mrb[68].mxu0 %vm1082_vm1, %v3009_v5  ;;  %v3000_v7 = vmax.f32 %v2984_v58, 0.0 }
 0x75f   : > { %v2983_v6 = vadd.f32 %v3955_v10, %v2940_v2  ;;  %v2998_v11 = vmax.f32 %v2982_v25, 0.0  ;;  %4377 = vmatpush3.bf16.msra.mxu0 %v4607_v54 }
 0x760   : > { %v3001_v13 = vmax.f32 %v2985_v0, 0.0  ;;  %4378 = vmatprep.subr.bf16.mxu0 %v5116_v34 }
 0x761   : > { %v2999_v15 = vmax.f32 %v2983_v6, 0.0 }
 0x762   : > { %v3011_v20 = vpack.c.bf16 %v3001_v13, %v3000_v7 }
 0x763   : > { %v3010_v26 = vpack.c.bf16 %v2999_v15, %v2998_v11  ;;  %v4346_v21 = vpop.f32.mrb[76].mxu1  ;;  %4379 = vmatpush3.bf16.msra.mxu0 %v4608_v8 }
 0x764   : > { %v2988_v22 = vadd.f32 %v4346_v21, %v3955_v10  ;;  %v2953_v29 = vpop.f32.mrb[77].mxu1  ;;  %4384 = vmatprep.subr.bf16.mxu0 %v5116_v34 }
 0x765   : > { %v2986_v31 = vadd.f32 %v3955_v10, %v2953_v29  ;;  %v4347_v32 = vpop.f32.mrb[78].mxu1  ;;  %4364 = vmatprep.mubr.msk.bf16.mxu0 %vm1082_vm1, %v3010_v26 }
 0x766   : > { %v2989_v16 = vadd.f32 %v4347_v32, %v3955_v10  ;;  %v2956_v30 = vpop.f32.mrb[79].mxu1  ;;  %4365 = vmatmul.mubr.msk.bf16.gmra.mrb[72].mxu0 %vm1082_vm1, %v3011_v20  ;;  %v3004_v42 = vmax.f32 %v2988_v22, 0.0 }
 0x767   : > { %v2987_v33 = vadd.f32 %v3955_v10, %v2956_v30  ;;  %v3002_v39 = vmax.f32 %v2986_v31, 0.0 }
 0x768   : > { %v3005_v45 = vmax.f32 %v2989_v16, 0.0 }
 0x769   : > { %v3003_v52 = vmax.f32 %v2987_v33, 0.0 }
 0x76a   : > { %v3013_v47 = vpack.c.bf16 %v3005_v45, %v3004_v42 }
 0x76b   : > { %v3012_v48 = vpack.c.bf16 %v3003_v52, %v3002_v39 }
 0x76d   : > { %4368 = vmatprep.mubr.msk.bf16.mxu0 %vm1082_vm1, %v3012_v48 }
 0x76e   : > { %4369 = vmatmul.mubr.msk.bf16.gmra.mrb[76].mxu0 %vm1082_vm1, %v3013_v47 }
 0x76f   : > { %4380 = vmatprep.mubr.msk.bf16.mxu0 %vm5117_vm2, %v5116_v34 }
 0x829   : > { %v4358_v9 = vpop.f32.mrb[64].mxu0 }
 0x82a   : > { %v3111_v10 = vadd.f32 %v4358_v9, %v6077_v4  ;;  %v3102_v17 = vpop.f32.mrb[65].mxu0 }
 0x82b   : > { %v3103_v18 = vadd.f32 %v6077_v4, %v3102_v17  ;;  %v4359_v23 = vpop.f32.mrb[66].mxu0 }
 0x82c   : > { %v3167_v24 = vmax.f32 %v3111_v10, 0.0  ;;  %v3114_v27 = vadd.f32 %v4359_v23, %v6077_v4  ;;  %v3105_v28 = vpop.f32.mrb[67].mxu0 }
 0x82d   : > { %v3165_v57 = vmax.f32 %v3103_v18, 0.0  ;;  %v3106_v61 = vadd.f32 %v6077_v4, %v3105_v28 }
 0x82e   : > { %v3195_v35 = vsel %vm1082_vm1, %v3167_v24, 0.0  ;;  %v3168_v36 = vmax.f32 %v3114_v27, 0.0 }
 0x82f   : > { %v3196_v44 = vrot.slane %v3195_v35, 4  ;;  %v3181_v43 = vsel %vm1082_vm1, %v3165_v57, 0.0  ;;  %v3166_v3 = vmax.f32 %v3106_v61, 0.0 }
 0x830   : > { %v3182_v1 = vrot.slane %v3181_v43, 4  ;;  %v3202_v56 = vsel %vm1082_vm1, %v3168_v36, 0.0 }
 0x831   : > { %v3197_v19 = vadd.f32 %v3196_v44, %v3195_v35  ;;  %v3203_v53 = vrot.slane %v3202_v56, 4  ;;  %v3188_v38 = vsel %vm1082_vm1, %v3166_v3, 0.0  ;;  %v4362_v62 = vpop.f32.mrb[68].mxu0 }
 0x832   : > { %v3183_v50 = vadd.f32 %v3182_v1, %v3181_v43  ;;  %v3189_v41 = vrot.slane %v3188_v38, 4  ;;  %v3127_v37 = vadd.f32 %v4362_v62, %v6077_v4  ;;  %v3118_v55 = vpop.f32.mrb[69].mxu0 }
 0x833   : > { %v3198_v46 = vrot.slane %v3197_v19, 2  ;;  %v3204_v63 = vadd.f32 %v3203_v53, %v3202_v56  ;;  %v3119_v12 = vadd.f32 %v6077_v4, %v3118_v55  ;;  %v4363_v5 = vpop.f32.mrb[70].mxu0 }
 0x834   : > { %v3184_v40 = vrot.slane %v3183_v50, 2  ;;  %v3190_v14 = vadd.f32 %v3189_v41, %v3188_v38  ;;  %v3171_v58 = vmax.f32 %v3127_v37, 0.0  ;;  %v3130_v59 = vadd.f32 %v4363_v5, %v6077_v4  ;;  %v3121_v25 = vpop.f32.mrb[71].mxu0 }
 0x835   : > { %v3199_v60 = vadd.f32 %v3198_v46, %v3197_v19  ;;  %v3205_v0 = vrot.slane %v3204_v63, 2  ;;  %v3169_v2 = vmax.f32 %v3119_v12, 0.0  ;;  %v3122_v6 = vadd.f32 %v6077_v4, %v3121_v25 }
 0x836   : > { %v3185_v7 = vadd.f32 %v3184_v40, %v3183_v50  ;;  %v3191_v13 = vrot.slane %v3190_v14, 2  ;;  %v3223_v11 = vsel %vm1082_vm1, %v3171_v58, 0.0  ;;  %v3172_v15 = vmax.f32 %v3130_v59, 0.0 }
 0x837   : > { %v3200_v20 = vrot.slane %v3199_v60, 1  ;;  %v3206_v26 = vadd.f32 %v3205_v0, %v3204_v63  ;;  %v3224_v21 = vrot.slane %v3223_v11, 4  ;;  %v3209_v22 = vsel %vm1082_vm1, %v3169_v2, 0.0 }
 0x838   : > { %v3186_v29 = vrot.slane %v3185_v7, 1  ;;  %v3192_v31 = vadd.f32 %v3191_v13, %v3190_v14  ;;  %v3210_v32 = vrot.slane %v3209_v22, 4  ;;  %v3230_v16 = vsel %vm1082_vm1, %v3172_v15, 0.0 }
 0x839   : > { %v3201_v30 = vadd.f32 %v3200_v20, %v3199_v60  ;;  %v3207_v33 = vrot.slane %v3206_v26, 1  ;;  %v3225_v42 = vadd.f32 %v3224_v21, %v3223_v11  ;;  %v3231_v45 = vrot.slane %v3230_v16, 4  ;;  %v4366_v39 = vpop.f32.mrb[72].mxu0 }
 0x83a   : > { %v3187_v52 = vadd.f32 %v3186_v29, %v3185_v7  ;;  %v3193_v47 = vrot.slane %v3192_v31, 1  ;;  %v3211_v48 = vadd.f32 %v3210_v32, %v3209_v22  ;;  %v3170_v49 = vmax.f32 %v3122_v6, 0.0  ;;  %v3134_v51 = vpop.f32.mrb[73].mxu0 }
 0x83b   : > { %v3239_v54 = vpack.c.bf16 %v3201_v30, %v3201_v30  ;;  %v3208_v8 = vadd.f32 %v3207_v33, %v3206_v26  ;;  %v3226_v9 = vrot.slane %v3225_v42, 2  ;;  %v3232_v10 = vadd.f32 %v3231_v45, %v3230_v16  ;;  %v4367_v17 = vpop.f32.mrb[74].mxu0 }
 0x83c   : > { %v3237_v18 = vpack.c.bf16 %v3187_v52, %v3187_v52  ;;  %v3194_v23 = vadd.f32 %v3193_v47, %v3192_v31  ;;  %v3212_v24 = vrot.slane %v3211_v48, 2  ;;  %v3216_v27 = vsel %vm1082_vm1, %v3170_v49, 0.0  ;;  %v3137_v28 = vpop.f32.mrb[75].mxu0 }
 0x83d   : > { %v3240_v57 = vpack.c.bf16 %v3208_v8, %v3208_v8  ;;  %v3227_v61 = vadd.f32 %v3226_v9, %v3225_v42  ;;  %v3233_v35 = vrot.slane %v3232_v10, 2  ;;  %v3417_v36 = vunpack.c.l.b16 %v3239_v54 }
 0x83e   : > { %v3238_v44 = vpack.c.bf16 %v3194_v23, %v3194_v23  ;;  %v3213_v43 = vadd.f32 %v3212_v24, %v3211_v48  ;;  %v3217_v3 = vrot.slane %v3216_v27, 4  ;;  %v3415_v1 = vunpack.c.l.b16 %v3237_v18 }
 0x83f   : > { %v3228_v56 = vrot.slane %v3227_v61, 1  ;;  %v3234_v19 = vadd.f32 %v3233_v35, %v3232_v10  ;;  %v3143_v53 = vadd.f32 %v4366_v39, %v6077_v4  ;;  %v3135_v41 = vadd.f32 %v6077_v4, %v3134_v51 }
 0x840   : > { %v3416_v38 = vunpack.c.l.b16 %v3238_v44  ;;  %v3214_v62 = vrot.slane %v3213_v43, 1  ;;  %v3218_v50 = vadd.f32 %v3217_v3, %v3216_v27  ;;  %v3418_v37 = vunpack.c.l.b16 %v3240_v57 }
 0x841   : > { %v6097_v55 = vadd.f32 %v3228_v56, %v3227_v61  ;;  %v3175_v46 = vmax.f32 %v3143_v53, 0.0  ;;  %v3146_v63 = vadd.f32 %v4367_v17, %v6077_v4  ;;  %v4370_v12 = vpop.f32.mrb[76].mxu0  ;;  %v3173_v58 = vmax.f32 %v3135_v41, 0.0 }
 0x842   : > { %v3423_v5 = vsel %vm3325_vm5, %v3416_v38, %v3415_v1  ;;  %v3215_v40 = vadd.f32 %v3214_v62, %v3213_v43  ;;  %v3219_v14 = vrot.slane %v3218_v50, 2  ;;  %v3150_v59 = vpop.f32.mrb[77].mxu0  ;;  %v3235_v60 = vrot.slane %v3234_v19, 1 }
 0x843   : > { %v3424_v25 = vsel %vm3327_vm6, %v3417_v36, %v3423_v5  ;;  %v3259_v0 = vsel %vm1082_vm1, %v3175_v46, 0.0  ;;  %v4371_v2 = vpop.f32.mrb[78].mxu0  ;;  %v3243_v20 = vpack.c.bf16 %v6097_v55, %v6097_v55  ;;  %v3245_v26 = vsel %vm1082_vm1, %v3173_v58, 0.0 }
 0x844   : > { %v3241_v6 = vpack.c.bf16 %v3215_v40, %v3215_v40  ;;  %v3425_v7 = vsel %vm3329_vm7, %v3418_v37, %v3424_v25  ;;  %v3220_v13 = vadd.f32 %v3219_v14, %v3218_v50  ;;  %v3260_v11 = vrot.slane %v3259_v0, 4  ;;  %v3153_v15 = vpop.f32.mrb[79].mxu0 }
 0x845   : > { %v3176_v21 = vmax.f32 %v3146_v63, 0.0  ;;  %v3246_v32 = vrot.slane %v3245_v26, 4  ;;  %v3236_v16 = vadd.f32 %v3235_v60, %v3234_v19  ;;  %v3138_v33 = vadd.f32 %v6077_v4, %v3137_v28 }
 0x846   : > { %v3419_v22 = vunpack.c.l.b16 %v3241_v6  ;;  %v3221_v29 = vrot.slane %v3220_v13, 1  ;;  %v3261_v31 = vadd.f32 %v3260_v11, %v3259_v0  ;;  %v3159_v42 = vadd.f32 %v4370_v12, %v6077_v4 }
 0x847   : > { %v3266_v30 = vsel %vm1082_vm1, %v3176_v21, 0.0  ;;  %v3247_v47 = vadd.f32 %v3246_v32, %v3245_v26  ;;  %v3174_v49 = vmax.f32 %v3138_v33, 0.0  ;;  %v3151_v54 = vadd.f32 %v6077_v4, %v3150_v59 }
 0x848   : > { %v3426_v45 = vsel %vm3331_vm8, %v3419_v22, %v3425_v7  ;;  %v3222_v39 = vadd.f32 %v3221_v29, %v3220_v13  ;;  %v3262_v52 = vrot.slane %v3261_v31, 2  ;;  %v3267_v48 = vrot.slane %v3266_v30, 4 }
 0x849   : > { %v3179_v51 = vmax.f32 %v3159_v42, 0.0  ;;  %v3248_v10 = vrot.slane %v3247_v47, 2  ;;  %v3162_v17 = vadd.f32 %v4371_v2, %v6077_v4  ;;  %v3252_v23 = vsel %vm1082_vm1, %v3174_v49, 0.0 }
 0x84a   : > { %v3242_v8 = vpack.c.bf16 %v3222_v39, %v3222_v39  ;;  %v3263_v9 = vadd.f32 %v3262_v52, %v3261_v31  ;;  %v3268_v18 = vadd.f32 %v3267_v48, %v3266_v30  ;;  %v3177_v27 = vmax.f32 %v3151_v54, 0.0 }
 0x84b   : > { %v3287_v24 = vsel %vm1082_vm1, %v3179_v51, 0.0  ;;  %v3244_v28 = vpack.c.bf16 %v3236_v16, %v3236_v16  ;;  %v3249_v61 = vadd.f32 %v3248_v10, %v3247_v47  ;;  %v3253_v35 = vrot.slane %v3252_v23, 4 }
 0x84c   : > { %v3420_v57 = vunpack.c.l.b16 %v3242_v8  ;;  %v3269_v36 = vrot.slane %v3268_v18, 2  ;;  %v3288_v44 = vrot.slane %v3287_v24, 4  ;;  %v3273_v43 = vsel %vm1082_vm1, %v3177_v27, 0.0 }
 0x84d   : > { %v3180_v3 = vmax.f32 %v3162_v17, 0.0  ;;  %v3264_v56 = vrot.slane %v3263_v9, 1  ;;  %v3250_v19 = vrot.slane %v3249_v61, 1  ;;  %v3254_v53 = vadd.f32 %v3253_v35, %v3252_v23 }
 0x84e   : > { %v3427_v1 = vsel %vm3333_vm9, %v3420_v57, %v3426_v45  ;;  %v3270_v38 = vadd.f32 %v3269_v36, %v3268_v18  ;;  %v3289_v62 = vadd.f32 %v3288_v44, %v3287_v24  ;;  %v3274_v50 = vrot.slane %v3273_v43, 4 }
 0x84f   : > { %v3294_v41 = vsel %vm1082_vm1, %v3180_v3, 0.0  ;;  %v3251_v37 = vadd.f32 %v3250_v19, %v3249_v61  ;;  %v3255_v55 = vrot.slane %v3254_v53, 2  ;;  %v3154_v40 = vadd.f32 %v6077_v4, %v3153_v15 }
 0x850   : > { %v3295_v46 = vrot.slane %v3294_v41, 4  ;;  %v3271_v63 = vrot.slane %v3270_v38, 1  ;;  %v3290_v12 = vrot.slane %v3289_v62, 2  ;;  %v3275_v5 = vadd.f32 %v3274_v50, %v3273_v43  ;;  %v4610_v50 = vld [vmem:[#allocation14 + $0x8] sm:$0xff]  }
 0x851   : > { %v3421_v14 = vunpack.c.l.b16 %v3243_v20  ;;  %v3256_v58 = vadd.f32 %v3255_v55, %v3254_v53  ;;  %v3422_v25 = vunpack.c.l.b16 %v3244_v28  ;;  %v3265_v60 = vadd.f32 %v3264_v56, %v3263_v9 }
 0x852   : > { %v3296_v59 = vadd.f32 %v3295_v46, %v3294_v41  ;;  %v3276_v0 = vrot.slane %v3275_v5, 2  ;;  %v3178_v2 = vmax.f32 %v3154_v40, 0.0  ;;  %v3272_v6 = vadd.f32 %v3271_v63, %v3270_v38  ;;  %v4609_v38 = vld [vmem:[#allocation14] sm:$0xff]   ;;  %v4611_v41 = vld [vmem:[#allocation14 + $0x10] sm:$0xff]   ;;  %v4614_v63 = vld [vmem:[#allocation17 + $0x8] sm:$0xff]  }
 0x853   : > { %v3257_v7 = vrot.slane %v3256_v58, 1  ;;  %v3428_v11 = vsel %vm3335_vm10, %v3421_v14, %v3427_v1  ;;  %v3301_v26 = vpack.c.bf16 %v3251_v37, %v3251_v37  ;;  %v3291_v21 = vadd.f32 %v3290_v12, %v3289_v62  ;;  %v4612_v37 = vld [vmem:[#allocation14 + $0x18] sm:$0xff]   ;;  %v4613_v46 = vld [vmem:[#allocation17] sm:$0xff]   ;;  %v4615_v12 = vld [vmem:[#allocation17 + $0x10] sm:$0xff]  }
 0x854   : > { %v3297_v13 = vrot.slane %v3296_v59, 2  ;;  %v3277_v22 = vadd.f32 %v3276_v0, %v3275_v5  ;;  %v3280_v29 = vsel %vm1082_vm1, %v3178_v2, 0.0  ;;  %v3429_v20 = vsel %vm3337_vm11, %v3422_v25, %v3428_v11  ;;  %4397 = vmatpush3.bf16.msra.mxu1 %v4613_v46  ;;  %v4616_v5 = vld [vmem:[#allocation17 + $0x18] sm:$0xff]   ;;  %v4617_v40 = vld [vmem:[#allocation19] sm:$0xff]   ;;  %v4618_v14 = vld [vmem:[#allocation19 + $0x8] sm:$0xff]  }
 0x855   : > { %v3258_v31 = vadd.f32 %v3257_v7, %v3256_v58  ;;  %v3281_v15 = vrot.slane %v3280_v29, 4  ;;  %v3303_v32 = vpack.c.bf16 %v3265_v60, %v3265_v60  ;;  %v3304_v30 = vpack.c.bf16 %v3272_v6, %v3272_v6  ;;  %4398 = vmatprep.subr.bf16.mxu1 %v5116_v34  ;;  %v3979_v0 = vld [vmem:[%s6291_s6] ss:$0 sm:$0xff]  ;;  %s5017_s6 = scalar_lea.vmem %s5016_s23, 256 }
 0x856   : > { %v3298_v4 = vadd.f32 %v3297_v13, %v3296_v59  ;;  %v3278_v16 = vrot.slane %v3277_v22, 1  ;;  %v3292_v45 = vrot.slane %v3291_v21, 1  ;;  %v3317_v52 = vunpack.c.l.b16 %v3301_v26  ;;  %p5019_p3 = scmp.lt.s32.totalorder %s5017_s6, %s5011_s1 }
 0x857   : > { %v3302_v33 = vpack.c.bf16 %v3258_v31, %v3258_v31  ;;  %v3282_v42 = vadd.f32 %v3281_v15, %v3280_v29  ;;  %v3319_v51 = vunpack.c.l.b16 %v3303_v32  ;;  %v3320_v8 = vunpack.c.l.b16 %v3304_v30  ;;  %v4619_v29 = vld [vmem:[#allocation19 + $0x10] sm:$0xff]   ;;  %v4620_v31 = vld [vmem:[#allocation19 + $0x18] sm:$0xff]  }
 0x858   : > { %v3279_v39 = vadd.f32 %v3278_v16, %v3277_v22  ;;  %v3299_v48 = vrot.slane %v3298_v4, 1  ;;  %v3293_v18 = vadd.f32 %v3292_v45, %v3291_v21  ;;  %v3430_v55 = vpack.c.b16 %v3429_v20, %v3429_v20  ;;  %4399 = vmatpush3.bf16.msra.mxu1 %v4614_v63  ;;  %p5020_p12 = por %p5019_p3, %p5018_p11 }
 0x859   : > { %v3318_v47 = vunpack.c.l.b16 %v3302_v33  ;;  %v3283_v49 = vrot.slane %v3282_v42, 2  ;;  %4400 = vmatprep.subr.bf16.mxu1 %v5116_v34 }
 0x85a   : > { %v3305_v54 = vpack.c.bf16 %v3279_v39, %v3279_v39  ;;  %v3300_v27 = vadd.f32 %v3299_v48, %v3298_v4  ;;  %v3307_v35 = vpack.c.bf16 %v3293_v18, %v3293_v18  ;;  %v3980_v4 = vld [vmem:[%s6292_s2] ss:$0 sm:$0xff]  ;;  %p5021_p1 = pnand %p5020_p12, %p5014_p8 }
 0x85b   : > { %v3326_v9 = vsel %vm3325_vm5, %v3318_v47, %v3317_v52  ;;  %v3284_v10 = vadd.f32 %v3283_v49, %v3282_v42 }
 0x85c   : > { %v3328_v17 = vsel %vm3327_vm6, %v3319_v51, %v3326_v9  ;;  %v3321_v23 = vunpack.c.l.b16 %v3305_v54  ;;  %v3308_v36 = vpack.c.bf16 %v3300_v27, %v3300_v27  ;;  %v3323_v3 = vunpack.c.l.b16 %v3307_v35  ;;  %4401 = vmatpush3.bf16.msra.mxu1 %v4615_v12 }
 0x85d   : > { %v3330_v24 = vsel %vm3329_vm7, %v3320_v8, %v3328_v17  ;;  %v3285_v28 = vrot.slane %v3284_v10, 1  ;;  %4402 = vmatprep.subr.bf16.mxu1 %v5116_v34 }
 0x85e   : > { %v3332_v57 = vsel %vm3331_vm8, %v3321_v23, %v3330_v24  ;;  %v3324_v1 = vunpack.c.l.b16 %v3308_v36 }
 0x85f   : > { %v3286_v61 = vadd.f32 %v3285_v28, %v3284_v10 }
 0x860   : > { %4403 = vmatpush3.bf16.msra.mxu1 %v4616_v5 }
 0x861   : > { %v3306_v44 = vpack.c.bf16 %v3286_v61, %v3286_v61 }
 0x863   : > { %v3322_v43 = vunpack.c.l.b16 %v3306_v44 }
 0x865   : > { %v3334_v56 = vsel %vm3333_vm9, %v3322_v43, %v3332_v57 }
 0x866   : > { %v3336_v19 = vsel %vm3335_vm10, %v3323_v3, %v3334_v56 }
 0x867   : > { %v3338_v53 = vsel %vm3337_vm11, %v3324_v1, %v3336_v19 }
 0x868   : > { %v3339_v62 = vpack.c.b16 %v3338_v53, %v3338_v53 }
 0x86a   : > { %4381 = vmatmul.mubr.msk.bf16.vlgmr.msra.gmra.mrb[80].mxu0 %vm1082_vm1, %v3339_v62 }
 0x86b   : > { %4385 = vmatpush3.bf16.msra.mxu0 %v4609_v38  ;;  %4392 = vmatprep.mubr.msk.bf16.mxu0 %vm5117_vm2, %v5116_v34 }
 0x86c   : > { %4386 = vmatprep.subr.bf16.mxu0 %v5116_v34 }
 0x86f   : > { %4387 = vmatpush3.bf16.msra.mxu0 %v4610_v50 }
 0x870   : > { %4388 = vmatprep.subr.bf16.mxu0 %v5116_v34 }
 0x873   : > { %4389 = vmatpush3.bf16.msra.mxu0 %v4611_v41 }
 0x874   : > { %4390 = vmatprep.subr.bf16.mxu0 %v5116_v34 }
 0x877   : > { %4391 = vmatpush3.bf16.msra.mxu0 %v4612_v37 }
 0x878   : > { %4408 = vmatprep.subr.bf16.mxu0 %v5116_v34 }
 0x87a   : > { %4393 = vmatmul.mubr.msk.bf16.vlgmr.msra.gmra.mrb[84].mxu0 %vm1082_vm1, %v3430_v55 }
 0x87b   : > { %4416 = vmatprep.mubr.msk.bf16.mxu0 %vm5117_vm2, %v5116_v34  ;;  %4409 = vmatpush3.bf16.msra.mxu0 %v4617_v40 }
 0x87c   : > { %4410 = vmatprep.subr.bf16.mxu0 %v5116_v34 }
 0x87f   : > { %4411 = vmatpush3.bf16.msra.mxu0 %v4618_v14 }
 0x880   : > { %4412 = vmatprep.subr.bf16.mxu0 %v5116_v34 }
 0x883   : > { %4413 = vmatpush3.bf16.msra.mxu0 %v4619_v29 }
 0x884   : > { %4414 = vmatprep.subr.bf16.mxu0 %v5116_v34  ;;  %v3986_v34 = vld [vmem:[%s6293_s19] ss:$0 sm:$0xff] }
 0x887   : > { %4415 = vmatpush3.bf16.msra.mxu0 %v4620_v31 }
 0x93d   : > { %v3401_v58 = vpop.f32.mrb[80].mxu0 }
 0x93e   : > { %v4382_v59 = vpop.f32.mrb[81].mxu0 }
 0x93f   : > { %v3404_v25 = vpop.f32.mrb[82].mxu0 }
 0x940   : > { %v4383_v60 = vpop.f32.mrb[83].mxu0 }
 0x94d   : > { %v3492_v2 = vpop.f32.mrb[84].mxu0 }
 0x94e   : > { %v3493_v6 = vadd.f32 %v3492_v2, %v3401_v58  ;;  %v4394_v7 = vpop.f32.mrb[85].mxu0 }
 0x94f   : > { %v3495_v13 = vpop.f32.mrb[86].mxu0 }
 0x950   : > { %v3504_v11 = vadd.f32 %v3979_v0, %v3493_v6  ;;  %v4395_v26 = vpop.f32.mrb[87].mxu0 }
 0x952   : > { %v3505_v21 = vmax.f32 %v3504_v11, 0.0 }
 0x954   : > { %v3506_v22 = vpack.c.bf16 %v3505_v21, %v3505_v21 }
 0x956   : > { %4405 = vmatmul.mubr.msk.bf16.vlgmr.msra.gmra.mrb[80].mxu1 %vm1082_vm1, %v3506_v22 }
 0xa29   : > { %v3574_v15 = vpop.f32.mrb[80].mxu1 }
 0xa2a   : > { %v3575_v20 = vadd.f32 %v3980_v4, %v3574_v15  ;;  %v4406_v32 = vpop.f32.mrb[81].mxu1 }
 0xa2b   : > { %v3577_v16 = vpop.f32.mrb[82].mxu1 }
 0xa2c   : > { %v3580_v30 = vmax.f32 %v3575_v20, 0.0  ;;  %v4407_v33 = vpop.f32.mrb[83].mxu1 }
 0xa2e   : > { %v3581_v42 = vpack.c.bf16 %v3580_v30, %v3580_v30 }
 0xa30   : > { %4417 = vmatmul.mubr.msk.bf16.vlgmr.msra.gmra.mrb[88].mxu0 %vm1082_vm1, %v3581_v42 }
 0xb03   : > { %v3649_v45 = vpop.f32.mrb[88].mxu0 }
 0xb04   : > { %v3650_v39 = vadd.f32 %v3986_v34, %v3649_v45  ;;  %v4418_v52 = vpop.f32.mrb[89].mxu0 }
 0xb05   : > { %v3652_v47 = vpop.f32.mrb[90].mxu0 }
 0xb06   : > { %3655 = vst [vmem:[%s761_s24] sm:$0xff] %v3650_v39  ;;  %v4419_v48 = vpop.f32.mrb[91].mxu0 }
 0xb07   : > { %5024 = shalt.err (!%p5021_p1)
}
 0xb08   : > { %s5025_s5 = scalar_lea.hbm %s6161_s0, 128  ;;  %s5029_s2 = scalar_lea.hbm %s6294_s9, 256 }
 0xb09   : > { %p5026_p13 = scmp.ne.s32.totalorder %s6161_s0, %s5025_s5  ;;  %p5030_p2 = scmp.lt.u32.totalorder %s6161_s0, %s6294_s9 }
 0xb0a   : > { %p5031_p6 = scmp.lt.u32.totalorder %s5029_s2, %s5025_s5  ;;  %p5033_p5 = scmp.lt.u32.totalorder %s5025_s5, %s6161_s0 }
 0xb0b   : > { %p5027_p0 = pnand %p5026_p13, %p6295_p9 }
 0xb0c   : > { %p5032_p10 = por %p5031_p6, %p5030_p2 }
 0xb0d   : > { %p5028_p7 = pneg %p5027_p0 }
 0xb0e   : > { %p5034_p4 = por %p5033_p5, %p5032_p10 }
 0xb10   : > { %p5035_p8 = pnand %p5034_p4, %p5028_p7 }
 0xb12   : > { %5038 = shalt.err (!%p5035_p8)
}
 0xb13   : > { %4476 = dma.vmem_to_hbm [thread:$0]  (%p6295_p9), %s6163_s14, 128, %s6161_s0, %s3657_s20  }
 0xb14 PF: > { %s3682_s13 = sand.u32 1, %s5089_s27   ;;  %p6296_p11 = scmp.ne.s32.totalorder %s6270_s22, 0 }
 0xb15   : > { %p6297_p3 = scmp.ge.s32.totalorder %s5101_s30, 2  ;;  %s3683_s19 = scalar_lea.sflag [#allocation4], %s3682_s13 }
 0xb17   : > { %p4514_p12 = pnand %p6297_p3, %p6296_p11 }
 0xb19   : > { %5084 = dma.done.wait (!%p4514_p12), %s3683_s19, 128  }
 0xb1a   : > { %5086 = vsyncadd (!%p4514_p12), %s3683_s19, 4294967168  ;;  %p38_p1 = scmp.ge.s32.totalorder %s5468_s21, 4   ;;  %s6298_s27 = smov %s5093_s28 }
 0xb1b   : > { %s6299_s28 = smov %s5097_s29  ;;  %s6300_s29 = smov %s5480_s25 }
 0xb1c   : > { %s6301_s30 = smov %s5468_s21  ;;  %40 = sbr.rel (!%p38_p1) target bundleno = 30 (0x1e), region = 186 }
 0xb23   :  { %3688 = vsyncpa [#allocation3], 1 }
 0xb24   :  { %3690 = vsyncpa [#allocation3 + $0x1], 1 }
 0xb25   :  { %3691 = vsyncpa [#allocation6], 1 }
 0xb26   :  { %3693 = vsyncpa [#allocation6 + $0x1], 1 }
 0xb27   :  { %3694 = vsyncpa [#allocation9], 1 }
 0xb28   :  { %3695 = vsyncpa [#allocation12], 1 }
 0xb29   :  { %3696 = vsyncpa [#allocation15], 1 }
 0xb2a   :  { %3697 = vsyncpa [#allocation18], 1 }
 0xb2b   :  { %3698 = vsyncpa [#allocation4], 1 }
 0xb2c   :  { %3700 = vsyncpa [#allocation4 + $0x1], 1 }

</bundles_post_ra>
